<compile_context>
chip_gen: v7x
topology: tpu7x:2x2x1
jax: 0.10.0
libtpu: 0.0.40
codegen_flags: <defaults>
</compile_context>

<pallas_src>
import functools

import jax
import jax.numpy as jnp
from jax.experimental import pallas as pl
from jax.experimental.pallas import tpu as pltpu


# ----------------------------------------------------------------------------
# Fused kernel: conv1 -> conv2 -> conv3 -> fc1 -> fc2 for a TB-image batch tile
# ----------------------------------------------------------------------------
def _dqn_fused_kernel(x_ref, w1, b1, w2, b2, w3, b3, wf1, bf1, wf2, bf2,
                      o_ref, a1s, a2s, a3s, *,
                      TB, Hc, Wc, C1e, Ho2, Wo2, C2, K3, Ho3, Wo3, C3,
                      n_sp, KP):
    f32 = jnp.float32

    # ---- conv1 (k=8, s=4): one matmul, 128-lane-dense output ----------------
    # x_ref: (1, TB, Hc*Wc, 144) wrapper-built 12x12 windows, one per 2x2 cell.
    p1 = x_ref[...].reshape(TB * Hc * Wc, KP)
    a1 = jnp.maximum(jnp.dot(p1, w1[...], preferred_element_type=f32) + b1[...],
                     0.0)                                   # (TB*Hc*Wc, 128)
    a1s[...] = a1.reshape(TB, Hc, Wc, C1e)

    # ---- conv2 (k=4, s=2) == k=2,s=1 conv over cells (Cin=128): kn2row ------
    acc2 = None
    for a in range(2):
        for b in range(2):
            v = a1s[:, pl.ds(a, Ho2), pl.ds(b, Wo2), :].reshape(
                TB * Ho2 * Wo2, C1e)
            d = jnp.dot(v, w2[2 * a + b], preferred_element_type=f32)
            acc2 = d if acc2 is None else acc2 + d
    a2 = jnp.maximum(acc2 + b2[...], 0.0)                   # (TB*Ho2*Wo2, 64)
    a2s[...] = a2.reshape(TB, Ho2, Wo2, C2)

    # ---- conv3 (k=3, s=1): kn2row, 9 accumulated matmuls --------------------
    acc3 = None
    for kh in range(K3):
        for kw in range(K3):
            v = a2s[:, pl.ds(kh, Ho3), pl.ds(kw, Wo3), :].reshape(
                TB * Ho3 * Wo3, C2)
            d = jnp.dot(v, w3[kh * K3 + kw], preferred_element_type=f32)
            acc3 = d if acc3 is None else acc3 + d
    a3 = jnp.maximum(acc3 + b3[...], 0.0)                   # (TB*n_sp, 64)
    a3s[...] = a3.reshape(TB, n_sp, C3)

    # ---- flatten + fc1: accumulated per-spatial-site dots -------------------
    # (fc1 weight pre-permuted so PyTorch's NCHW flatten order is absorbed.)
    accf = None
    for s in range(n_sp):
        d = jnp.dot(a3s[:, s, :], wf1[pl.ds(s * C3, C3), :],
                    preferred_element_type=f32)
        accf = d if accf is None else accf + d
    h = jnp.maximum(accf + bf1[...], 0.0)                   # (TB, 512)

    # ---- fc2: lane-dense (padded to 128) full-width store -------------------
    logits = jnp.dot(h, wf2[...], preferred_element_type=f32) + bf2[...]
    o_ref[...] = logits.reshape(1, TB, -1).astype(o_ref.dtype)


# ----------------------------------------------------------------------------
# Wrapper: layout / weight prep + single pallas_call
# ----------------------------------------------------------------------------
def dqn_forward_pallas(x, p, *, num_actions):
    B, Cin, H, W = x.shape
    assert Cin == 1, "DQNetwork uses a single input channel"
    K1, S1 = 8, 4
    assert (H - K1) % S1 == 0 and (W - K1) % S1 == 0
    Ho1 = (H - K1) // S1 + 1
    Wo1 = (W - K1) // S1 + 1
    assert Ho1 % 2 == 0 and Wo1 % 2 == 0, "cell decomposition needs even conv1 out"
    Hc, Wc = Ho1 // 2, Wo1 // 2                 # 2x2 output-pixel cells
    C1 = 32
    C1e = 4 * C1                                # (r,c,ch) packed in lanes = 128
    C2 = 64
    Ho2, Wo2 = Hc - 1, Wc - 1                   # == (Ho1-4)//2 + 1
    K3, C3 = 3, 64
    Ho3, Wo3 = Ho2 - K3 + 1, Wo2 - K3 + 1
    assert Ho3 > 0 and Wo3 > 0
    n_sp = Ho3 * Wo3
    fc_in = C3 * n_sp
    F1 = 512
    n_pad = 128
    assert num_actions <= n_pad
    KP = (3 * S1) * (3 * S1)                    # 12x12 window per cell = 144

    # Batch tiling: fold TB images into M per grid step; keep >= 2 grid steps
    # so both v7x TensorCores get work under dimension_semantics=("parallel",).
    TB = max(1, min(16, (B + 1) // 2))
    G = -(-B // TB)
    Bp = G * TB

    # --- conv1 im2col in the wrapper: one 12x12 window per 2x2 output cell ---
    x2 = x[:, 0]                                                    # (B, H, W)
    rows = jnp.stack([x2[:, 2 * S1 * i:2 * S1 * i + 3 * S1, :]
                      for i in range(Hc)], axis=1)                  # (B,Hc,12,W)
    wins = jnp.stack([rows[..., 2 * S1 * j:2 * S1 * j + 3 * S1]
                      for j in range(Wc)], axis=2)                  # (B,Hc,Wc,12,12)
    patches = wins.reshape(B, Hc * Wc, KP)
    if Bp != B:
        patches = jnp.pad(patches, ((0, Bp - B), (0, 0), (0, 0)))
    patches = patches.reshape(G, TB, Hc * Wc, KP)

    # --- weight prep (O(weights), constant layout work) ----------------------
    # conv1 -> (144, 128): 8x8 kernel placed at the 4 sub-positions of a cell;
    # output lanes ordered (r, c, ch).
    w1 = p["c1_w"][:, 0]                                            # (32, 8, 8)
    w1big = jnp.zeros((3 * S1, 3 * S1, 2, 2, C1), jnp.float32)
    for r in range(2):
        for c in range(2):
            w1big = w1big.at[S1 * r:S1 * r + K1, S1 * c:S1 * c + K1, r, c, :].set(
                w1.transpose(1, 2, 0))
    w1k = w1big.reshape(KP, C1e)
    b1k = jnp.tile(p["c1_b"], 4).reshape(1, C1e)

    # conv2 -> (4, 128, 64): [a*2+b][(r,c,ch), co] = W2[co, ch, 2a+r, 2b+c]
    w2k = (p["c2_w"].transpose(2, 3, 1, 0)          # (kh, kw, ch, co)
                    .reshape(2, 2, 2, 2, C1, C2)    # (a, r, b, c, ch, co)
                    .transpose(0, 2, 1, 3, 4, 5)    # (a, b, r, c, ch, co)
                    .reshape(4, C1e, C2))
    b2k = p["c2_b"].reshape(1, C2)

    # conv3 -> (9, 64, 64): [kh*3+kw][ch, co] = W3[co, ch, kh, kw]
    w3k = p["c3_w"].transpose(2, 3, 1, 0).reshape(K3 * K3, C2, C3)
    b3k = p["c3_b"].reshape(1, C3)

    # fc1 rows reordered from NCHW flatten (ch*n_sp + s) to (s*C3 + ch)
    wf1p = p["f1_w"].reshape(C3, n_sp, F1).transpose(1, 0, 2).reshape(fc_in, F1)
    bf1p = p["f1_b"].reshape(1, F1)
    wf2p = jnp.pad(p["f2_w"], ((0, 0), (0, n_pad - num_actions)))
    bf2p = jnp.pad(p["f2_b"], (0, n_pad - num_actions)).reshape(1, n_pad)

    kernel = functools.partial(
        _dqn_fused_kernel, TB=TB, Hc=Hc, Wc=Wc, C1e=C1e, Ho2=Ho2, Wo2=Wo2,
        C2=C2, K3=K3, Ho3=Ho3, Wo3=Wo3, C3=C3, n_sp=n_sp, KP=KP)

    def whole(rank):
        return lambda g: (0,) * rank

    out = pl.pallas_call(
        kernel,
        out_shape=jax.ShapeDtypeStruct((G, TB, n_pad), jnp.float32),
        grid=(G,),
        in_specs=[
            pl.BlockSpec((1, TB, Hc * Wc, KP), lambda g: (g, 0, 0, 0)),
            pl.BlockSpec(w1k.shape, whole(2)),
            pl.BlockSpec(b1k.shape, whole(2)),
            pl.BlockSpec(w2k.shape, whole(3)),
            pl.BlockSpec(b2k.shape, whole(2)),
            pl.BlockSpec(w3k.shape, whole(3)),
            pl.BlockSpec(b3k.shape, whole(2)),
            pl.BlockSpec(wf1p.shape, whole(2)),
            pl.BlockSpec(bf1p.shape, whole(2)),
            pl.BlockSpec(wf2p.shape, whole(2)),
            pl.BlockSpec(bf2p.shape, whole(2)),
        ],
        out_specs=pl.BlockSpec((1, TB, n_pad), lambda g: (g, 0, 0)),
        scratch_shapes=[
            pltpu.VMEM((TB, Hc, Wc, C1e), jnp.float32),   # conv1 act (cells, 128 lanes)
            pltpu.VMEM((TB, Ho2, Wo2, C2), jnp.float32),  # conv2 act
            pltpu.VMEM((TB, n_sp, C3), jnp.float32),      # conv3 act
        ],
        compiler_params=pltpu.CompilerParams(
            dimension_semantics=("parallel",)),
    )(patches, w1k, b1k, w2k, b2k, w3k, b3k, wf1p, bf1p, wf2p, bf2p)

    return out.reshape(Bp, n_pad)[:B, :num_actions]


# ----------------------------------------------------------------------------
# Parameter setup (deterministic, synthetic; (in, out) layout for FC weights)
# ----------------------------------------------------------------------------
def init_params(key, input_shape, num_actions):
    C, H, W = input_shape

    def conv_out(h, k, s):
        return (h - k) // s + 1

    h1, w1 = conv_out(H, 8, 4), conv_out(W, 8, 4)
    h2, w2 = conv_out(h1, 4, 2), conv_out(w1, 4, 2)
    h3, w3 = conv_out(h2, 3, 1), conv_out(w2, 3, 1)
    fc_in = 64 * h3 * w3

    ks = jax.random.split(key, 10)

    def init_w(k, shape, fan_in):
        return (jax.random.normal(k, shape, jnp.float32)
                / jnp.sqrt(fan_in)).astype(jnp.float32)

    params = {
        "c1_w": init_w(ks[0], (32, C, 8, 8), C * 8 * 8),
        "c1_b": init_w(ks[1], (32,), 32),
        "c2_w": init_w(ks[2], (64, 32, 4, 4), 32 * 4 * 4),
        "c2_b": init_w(ks[3], (64,), 64),
        "c3_w": init_w(ks[4], (64, 64, 3, 3), 64 * 3 * 3),
        "c3_b": init_w(ks[5], (64,), 64),
        "f1_w": init_w(ks[6], (fc_in, 512), fc_in),
        "f1_b": init_w(ks[7], (512,), 512),
        "f2_w": init_w(ks[8], (512, num_actions), 512),
        "f2_b": init_w(ks[9], (num_actions,), num_actions),
    }
    return params, fc_in


# ----------------------------------------------------------------------------
# Pure-JAX reference (matches the PyTorch module semantics)
# ----------------------------------------------------------------------------
def dqn_forward_ref(x, p):
    def conv(x, w, b, s):
        y = jax.lax.conv_general_dilated(
            x, w, window_strides=(s, s), padding="VALID",
            dimension_numbers=("NCHW", "OIHW", "NCHW"))
        return jax.nn.relu(y + b[None, :, None, None])

    x = conv(x, p["c1_w"], p["c1_b"], 4)
    x = conv(x, p["c2_w"], p["c2_b"], 2)
    x = conv(x, p["c3_w"], p["c3_b"], 1)
    x = x.reshape(x.shape[0], -1)
    x = jax.nn.relu(x @ p["f1_w"] + p["f1_b"])
    return x @ p["f2_w"] + p["f2_b"]


if __name__ == "__main__":
    # Small shapes consistent with the module: input (B=4, C=1, 44, 44)
    #   conv1 (k8,s4) -> 10x10, conv2 (k4,s2) -> 4x4, conv3 (k3,s1) -> 2x2
    #   fc_in = 64*2*2 = 256, num_actions = 2
    # Batch 4 -> batch tile TB=2 per grid step, grid=(2,).
    input_shape = (1, 44, 44)
    num_actions = 2
    batch = 4

    key = jax.random.PRNGKey(0)
    k_param, k_x = jax.random.split(key)
    params, fc_in = init_params(k_param, input_shape, num_actions)
    x = jax.random.normal(k_x, (batch,) + input_shape, jnp.float32)

    fwd = jax.jit(functools.partial(dqn_forward_pallas, num_actions=num_actions))
    out = jax.block_until_ready(fwd(x, params))
    ref = jax.block_until_ready(dqn_forward_ref(x, params))

    assert out.shape == (batch, num_actions), out.shape
    assert jnp.allclose(out, ref, atol=1e-3, rtol=1e-3), (out, ref)
    print("KERNEL_OK")
</pallas_src>

<mosaic_0001>
module attributes {stable_mosaic.version = 11 : i64} {
  func.func @_dqn_fused_kernel(%arg0: i32, %arg1: memref<1x2x25x144xf32, #tpu.memory_space<vmem>>, %arg2: memref<144x128xf32, #tpu.memory_space<vmem>>, %arg3: memref<1x128xf32, #tpu.memory_space<vmem>>, %arg4: memref<4x128x64xf32, #tpu.memory_space<vmem>>, %arg5: memref<1x64xf32, #tpu.memory_space<vmem>>, %arg6: memref<9x64x64xf32, #tpu.memory_space<vmem>>, %arg7: memref<1x64xf32, #tpu.memory_space<vmem>>, %arg8: memref<256x512xf32, #tpu.memory_space<vmem>>, %arg9: memref<1x512xf32, #tpu.memory_space<vmem>>, %arg10: memref<512x128xf32, #tpu.memory_space<vmem>>, %arg11: memref<1x128xf32, #tpu.memory_space<vmem>>, %arg12: memref<1x2x128xf32, #tpu.memory_space<vmem>>, %arg13: memref<2x5x5x128xf32, #tpu.memory_space<vmem>>, %arg14: memref<2x4x4x64xf32, #tpu.memory_space<vmem>>, %arg15: memref<2x4x64xf32, #tpu.memory_space<vmem>>) attributes {dimension_semantics = [#tpu.dimension_semantics<parallel>], iteration_bounds = array<i64: 2>, scalar_prefetch = 0 : i64, scratch_operands = 3 : i64, tpu.core_type = #tpu.core_type<tc>, window_params = [{transform_indices = @transform_0, window_bounds = array<i64: 1, 2, 25, 144>}, {pipeline_mode = #tpu.pipeline_mode<synchronous>, transform_indices = @transform_1, window_bounds = array<i64: 144, 128>}, {pipeline_mode = #tpu.pipeline_mode<synchronous>, transform_indices = @transform_2, window_bounds = array<i64: 1, 128>}, {pipeline_mode = #tpu.pipeline_mode<synchronous>, transform_indices = @transform_3, window_bounds = array<i64: 4, 128, 64>}, {pipeline_mode = #tpu.pipeline_mode<synchronous>, transform_indices = @transform_4, window_bounds = array<i64: 1, 64>}, {pipeline_mode = #tpu.pipeline_mode<synchronous>, transform_indices = @transform_5, window_bounds = array<i64: 9, 64, 64>}, {pipeline_mode = #tpu.pipeline_mode<synchronous>, transform_indices = @transform_6, window_bounds = array<i64: 1, 64>}, {pipeline_mode = #tpu.pipeline_mode<synchronous>, transform_indices = @transform_7, window_bounds = array<i64: 256, 512>}, {pipeline_mode = #tpu.pipeline_mode<synchronous>, transform_indices = @transform_8, window_bounds = array<i64: 1, 512>}, {pipeline_mode = #tpu.pipeline_mode<synchronous>, transform_indices = @transform_9, window_bounds = array<i64: 512, 128>}, {pipeline_mode = #tpu.pipeline_mode<synchronous>, transform_indices = @transform_10, window_bounds = array<i64: 1, 128>}, {transform_indices = @transform_11, window_bounds = array<i64: 1, 2, 128>}]} {
    %c0 = arith.constant 0 : index
    %c0_0 = arith.constant 0 : index
    %c0_1 = arith.constant 0 : index
    %c0_2 = arith.constant 0 : index
    %0 = vector.load %arg1[%c0, %c0_0, %c0_1, %c0_2] : memref<1x2x25x144xf32, #tpu.memory_space<vmem>>, vector<1x2x25x144xf32>
    %1 = vector.shape_cast %0 : vector<1x2x25x144xf32> to vector<50x144xf32>
    %c0_3 = arith.constant 0 : index
    %c0_4 = arith.constant 0 : index
    %2 = vector.load %arg2[%c0_3, %c0_4] : memref<144x128xf32, #tpu.memory_space<vmem>>, vector<144x128xf32>
    %cst = arith.constant dense<0.000000e+00> : vector<50x128xf32>
    %3 = tpu.matmul %1, %2, %cst {dimension_numbers = #tpu.dot_dimension_numbers<[1], [0], [0], [1], [0, 0, 1, 1], [], []>} : vector<50x144xf32>, vector<144x128xf32>, vector<50x128xf32> -> vector<50x128xf32>
    %c0_5 = arith.constant 0 : index
    %c0_6 = arith.constant 0 : index
    %4 = vector.load %arg3[%c0_5, %c0_6] : memref<1x128xf32, #tpu.memory_space<vmem>>, vector<1x128xf32>
    %5 = vector.broadcast %4 : vector<1x128xf32> to vector<50x128xf32>
    %6 = arith.addf %3, %5 : vector<50x128xf32>
    %cst_7 = arith.constant 0.000000e+00 : f32
    %7 = vector.broadcast %cst_7 : f32 to vector<50x128xf32>
    %8 = arith.maximumf %6, %7 : vector<50x128xf32>
    %9 = vector.shape_cast %8 : vector<50x128xf32> to vector<2x5x5x128xf32>
    %c0_8 = arith.constant 0 : index
    %c0_9 = arith.constant 0 : index
    %c0_10 = arith.constant 0 : index
    %c0_11 = arith.constant 0 : index
    %10 = vector.load %arg13[%c0_8, %c0_9, %c0_10, %c0_11] : memref<2x5x5x128xf32, #tpu.memory_space<vmem>>, vector<2x5x5x128xf32>
    tpu.vector_store %arg13[%c0_8, %c0_9, %c0_10, %c0_11], %9 {strides = array<i32>} : memref<2x5x5x128xf32, #tpu.memory_space<vmem>>, vector<2x5x5x128xf32>,
    %c0_12 = arith.constant 0 : index
    %c0_13 = arith.constant 0 : index
    %c0_14 = arith.constant 0 : index
    %c0_15 = arith.constant 0 : index
    %11 = vector.load %arg13[%c0_12, %c0_13, %c0_14, %c0_15] : memref<2x5x5x128xf32, #tpu.memory_space<vmem>>, vector<2x4x4x128xf32>
    %12 = vector.shape_cast %11 : vector<2x4x4x128xf32> to vector<32x128xf32>
    %c0_16 = arith.constant 0 : index
    %c0_17 = arith.constant 0 : index
    %c0_18 = arith.constant 0 : index
    %13 = vector.load %arg4[%c0_16, %c0_17, %c0_18] : memref<4x128x64xf32, #tpu.memory_space<vmem>>, vector<1x128x64xf32>
    %14 = vector.shape_cast %13 : vector<1x128x64xf32> to vector<128x64xf32>
    %cst_19 = arith.constant dense<0.000000e+00> : vector<32x64xf32>
    %15 = tpu.matmul %12, %14, %cst_19 {dimension_numbers = #tpu.dot_dimension_numbers<[1], [0], [0], [1], [0, 0, 1, 1], [], []>} : vector<32x128xf32>, vector<128x64xf32>, vector<32x64xf32> -> vector<32x64xf32>
    %c0_20 = arith.constant 0 : index
    %c0_21 = arith.constant 0 : index
    %c1 = arith.constant 1 : index
    %c0_22 = arith.constant 0 : index
    %16 = vector.load %arg13[%c0_20, %c0_21, %c1, %c0_22] : memref<2x5x5x128xf32, #tpu.memory_space<vmem>>, vector<2x4x4x128xf32>
    %17 = vector.shape_cast %16 : vector<2x4x4x128xf32> to vector<32x128xf32>
    %c1_23 = arith.constant 1 : index
    %c0_24 = arith.constant 0 : index
    %c0_25 = arith.constant 0 : index
    %18 = vector.load %arg4[%c1_23, %c0_24, %c0_25] : memref<4x128x64xf32, #tpu.memory_space<vmem>>, vector<1x128x64xf32>
    %19 = vector.shape_cast %18 : vector<1x128x64xf32> to vector<128x64xf32>
    %cst_26 = arith.constant dense<0.000000e+00> : vector<32x64xf32>
    %20 = tpu.matmul %17, %19, %cst_26 {dimension_numbers = #tpu.dot_dimension_numbers<[1], [0], [0], [1], [0, 0, 1, 1], [], []>} : vector<32x128xf32>, vector<128x64xf32>, vector<32x64xf32> -> vector<32x64xf32>
    %21 = arith.addf %15, %20 : vector<32x64xf32>
    %c0_27 = arith.constant 0 : index
    %c1_28 = arith.constant 1 : index
    %c0_29 = arith.constant 0 : index
    %c0_30 = arith.constant 0 : index
    %22 = vector.load %arg13[%c0_27, %c1_28, %c0_29, %c0_30] : memref<2x5x5x128xf32, #tpu.memory_space<vmem>>, vector<2x4x4x128xf32>
    %23 = vector.shape_cast %22 : vector<2x4x4x128xf32> to vector<32x128xf32>
    %c2 = arith.constant 2 : index
    %c0_31 = arith.constant 0 : index
    %c0_32 = arith.constant 0 : index
    %24 = vector.load %arg4[%c2, %c0_31, %c0_32] : memref<4x128x64xf32, #tpu.memory_space<vmem>>, vector<1x128x64xf32>
    %25 = vector.shape_cast %24 : vector<1x128x64xf32> to vector<128x64xf32>
    %cst_33 = arith.constant dense<0.000000e+00> : vector<32x64xf32>
    %26 = tpu.matmul %23, %25, %cst_33 {dimension_numbers = #tpu.dot_dimension_numbers<[1], [0], [0], [1], [0, 0, 1, 1], [], []>} : vector<32x128xf32>, vector<128x64xf32>, vector<32x64xf32> -> vector<32x64xf32>
    %27 = arith.addf %21, %26 : vector<32x64xf32>
    %c0_34 = arith.constant 0 : index
    %c1_35 = arith.constant 1 : index
    %c1_36 = arith.constant 1 : index
    %c0_37 = arith.constant 0 : index
    %28 = vector.load %arg13[%c0_34, %c1_35, %c1_36, %c0_37] : memref<2x5x5x128xf32, #tpu.memory_space<vmem>>, vector<2x4x4x128xf32>
    %29 = vector.shape_cast %28 : vector<2x4x4x128xf32> to vector<32x128xf32>
    %c3 = arith.constant 3 : index
    %c0_38 = arith.constant 0 : index
    %c0_39 = arith.constant 0 : index
    %30 = vector.load %arg4[%c3, %c0_38, %c0_39] : memref<4x128x64xf32, #tpu.memory_space<vmem>>, vector<1x128x64xf32>
    %31 = vector.shape_cast %30 : vector<1x128x64xf32> to vector<128x64xf32>
    %cst_40 = arith.constant dense<0.000000e+00> : vector<32x64xf32>
    %32 = tpu.matmul %29, %31, %cst_40 {dimension_numbers = #tpu.dot_dimension_numbers<[1], [0], [0], [1], [0, 0, 1, 1], [], []>} : vector<32x128xf32>, vector<128x64xf32>, vector<32x64xf32> -> vector<32x64xf32>
    %33 = arith.addf %27, %32 : vector<32x64xf32>
    %c0_41 = arith.constant 0 : index
    %c0_42 = arith.constant 0 : index
    %34 = vector.load %arg5[%c0_41, %c0_42] : memref<1x64xf32, #tpu.memory_space<vmem>>, vector<1x64xf32>
    %35 = vector.broadcast %34 : vector<1x64xf32> to vector<32x64xf32>
    %36 = arith.addf %33, %35 : vector<32x64xf32>
    %cst_43 = arith.constant 0.000000e+00 : f32
    %37 = vector.broadcast %cst_43 : f32 to vector<32x64xf32>
    %38 = arith.maximumf %36, %37 : vector<32x64xf32>
    %39 = vector.shape_cast %38 : vector<32x64xf32> to vector<2x4x4x64xf32>
    %c0_44 = arith.constant 0 : index
    %c0_45 = arith.constant 0 : index
    %c0_46 = arith.constant 0 : index
    %c0_47 = arith.constant 0 : index
    %40 = vector.load %arg14[%c0_44, %c0_45, %c0_46, %c0_47] : memref<2x4x4x64xf32, #tpu.memory_space<vmem>>, vector<2x4x4x64xf32>
    tpu.vector_store %arg14[%c0_44, %c0_45, %c0_46, %c0_47], %39 {strides = array<i32>} : memref<2x4x4x64xf32, #tpu.memory_space<vmem>>, vector<2x4x4x64xf32>,
    %c0_48 = arith.constant 0 : index
    %c0_49 = arith.constant 0 : index
    %c0_50 = arith.constant 0 : index
    %c0_51 = arith.constant 0 : index
    %41 = vector.load %arg14[%c0_48, %c0_49, %c0_50, %c0_51] : memref<2x4x4x64xf32, #tpu.memory_space<vmem>>, vector<2x2x2x64xf32>
    %42 = vector.shape_cast %41 : vector<2x2x2x64xf32> to vector<8x64xf32>
    %c0_52 = arith.constant 0 : index
    %c0_53 = arith.constant 0 : index
    %c0_54 = arith.constant 0 : index
    %43 = vector.load %arg6[%c0_52, %c0_53, %c0_54] : memref<9x64x64xf32, #tpu.memory_space<vmem>>, vector<1x64x64xf32>
    %44 = vector.shape_cast %43 : vector<1x64x64xf32> to vector<64x64xf32>
    %cst_55 = arith.constant dense<0.000000e+00> : vector<8x64xf32>
    %45 = tpu.matmul %42, %44, %cst_55 {dimension_numbers = #tpu.dot_dimension_numbers<[1], [0], [0], [1], [0, 0, 1, 1], [], []>} : vector<8x64xf32>, vector<64x64xf32>, vector<8x64xf32> -> vector<8x64xf32>
    %c0_56 = arith.constant 0 : index
    %c0_57 = arith.constant 0 : index
    %c1_58 = arith.constant 1 : index
    %c0_59 = arith.constant 0 : index
    %46 = vector.load %arg14[%c0_56, %c0_57, %c1_58, %c0_59] : memref<2x4x4x64xf32, #tpu.memory_space<vmem>>, vector<2x2x2x64xf32>
    %47 = vector.shape_cast %46 : vector<2x2x2x64xf32> to vector<8x64xf32>
    %c1_60 = arith.constant 1 : index
    %c0_61 = arith.constant 0 : index
    %c0_62 = arith.constant 0 : index
    %48 = vector.load %arg6[%c1_60, %c0_61, %c0_62] : memref<9x64x64xf32, #tpu.memory_space<vmem>>, vector<1x64x64xf32>
    %49 = vector.shape_cast %48 : vector<1x64x64xf32> to vector<64x64xf32>
    %cst_63 = arith.constant dense<0.000000e+00> : vector<8x64xf32>
    %50 = tpu.matmul %47, %49, %cst_63 {dimension_numbers = #tpu.dot_dimension_numbers<[1], [0], [0], [1], [0, 0, 1, 1], [], []>} : vector<8x64xf32>, vector<64x64xf32>, vector<8x64xf32> -> vector<8x64xf32>
    %51 = arith.addf %45, %50 : vector<8x64xf32>
    %c0_64 = arith.constant 0 : index
    %c0_65 = arith.constant 0 : index
    %c2_66 = arith.constant 2 : index
    %c0_67 = arith.constant 0 : index
    %52 = vector.load %arg14[%c0_64, %c0_65, %c2_66, %c0_67] : memref<2x4x4x64xf32, #tpu.memory_space<vmem>>, vector<2x2x2x64xf32>
    %53 = vector.shape_cast %52 : vector<2x2x2x64xf32> to vector<8x64xf32>
    %c2_68 = arith.constant 2 : index
    %c0_69 = arith.constant 0 : index
    %c0_70 = arith.constant 0 : index
    %54 = vector.load %arg6[%c2_68, %c0_69, %c0_70] : memref<9x64x64xf32, #tpu.memory_space<vmem>>, vector<1x64x64xf32>
    %55 = vector.shape_cast %54 : vector<1x64x64xf32> to vector<64x64xf32>
    %cst_71 = arith.constant dense<0.000000e+00> : vector<8x64xf32>
    %56 = tpu.matmul %53, %55, %cst_71 {dimension_numbers = #tpu.dot_dimension_numbers<[1], [0], [0], [1], [0, 0, 1, 1], [], []>} : vector<8x64xf32>, vector<64x64xf32>, vector<8x64xf32> -> vector<8x64xf32>
    %57 = arith.addf %51, %56 : vector<8x64xf32>
    %c0_72 = arith.constant 0 : index
    %c1_73 = arith.constant 1 : index
    %c0_74 = arith.constant 0 : index
    %c0_75 = arith.constant 0 : index
    %58 = vector.load %arg14[%c0_72, %c1_73, %c0_74, %c0_75] : memref<2x4x4x64xf32, #tpu.memory_space<vmem>>, vector<2x2x2x64xf32>
    %59 = vector.shape_cast %58 : vector<2x2x2x64xf32> to vector<8x64xf32>
    %c3_76 = arith.constant 3 : index
    %c0_77 = arith.constant 0 : index
    %c0_78 = arith.constant 0 : index
    %60 = vector.load %arg6[%c3_76, %c0_77, %c0_78] : memref<9x64x64xf32, #tpu.memory_space<vmem>>, vector<1x64x64xf32>
    %61 = vector.shape_cast %60 : vector<1x64x64xf32> to vector<64x64xf32>
    %cst_79 = arith.constant dense<0.000000e+00> : vector<8x64xf32>
    %62 = tpu.matmul %59, %61, %cst_79 {dimension_numbers = #tpu.dot_dimension_numbers<[1], [0], [0], [1], [0, 0, 1, 1], [], []>} : vector<8x64xf32>, vector<64x64xf32>, vector<8x64xf32> -> vector<8x64xf32>
    %63 = arith.addf %57, %62 : vector<8x64xf32>
    %c0_80 = arith.constant 0 : index
    %c1_81 = arith.constant 1 : index
    %c1_82 = arith.constant 1 : index
    %c0_83 = arith.constant 0 : index
    %64 = vector.load %arg14[%c0_80, %c1_81, %c1_82, %c0_83] : memref<2x4x4x64xf32, #tpu.memory_space<vmem>>, vector<2x2x2x64xf32>
    %65 = vector.shape_cast %64 : vector<2x2x2x64xf32> to vector<8x64xf32>
    %c4 = arith.constant 4 : index
    %c0_84 = arith.constant 0 : index
    %c0_85 = arith.constant 0 : index
    %66 = vector.load %arg6[%c4, %c0_84, %c0_85] : memref<9x64x64xf32, #tpu.memory_space<vmem>>, vector<1x64x64xf32>
    %67 = vector.shape_cast %66 : vector<1x64x64xf32> to vector<64x64xf32>
    %cst_86 = arith.constant dense<0.000000e+00> : vector<8x64xf32>
    %68 = tpu.matmul %65, %67, %cst_86 {dimension_numbers = #tpu.dot_dimension_numbers<[1], [0], [0], [1], [0, 0, 1, 1], [], []>} : vector<8x64xf32>, vector<64x64xf32>, vector<8x64xf32> -> vector<8x64xf32>
    %69 = arith.addf %63, %68 : vector<8x64xf32>
    %c0_87 = arith.constant 0 : index
    %c1_88 = arith.constant 1 : index
    %c2_89 = arith.constant 2 : index
    %c0_90 = arith.constant 0 : index
    %70 = vector.load %arg14[%c0_87, %c1_88, %c2_89, %c0_90] : memref<2x4x4x64xf32, #tpu.memory_space<vmem>>, vector<2x2x2x64xf32>
    %71 = vector.shape_cast %70 : vector<2x2x2x64xf32> to vector<8x64xf32>
    %c5 = arith.constant 5 : index
    %c0_91 = arith.constant 0 : index
    %c0_92 = arith.constant 0 : index
    %72 = vector.load %arg6[%c5, %c0_91, %c0_92] : memref<9x64x64xf32, #tpu.memory_space<vmem>>, vector<1x64x64xf32>
    %73 = vector.shape_cast %72 : vector<1x64x64xf32> to vector<64x64xf32>
    %cst_93 = arith.constant dense<0.000000e+00> : vector<8x64xf32>
    %74 = tpu.matmul %71, %73, %cst_93 {dimension_numbers = #tpu.dot_dimension_numbers<[1], [0], [0], [1], [0, 0, 1, 1], [], []>} : vector<8x64xf32>, vector<64x64xf32>, vector<8x64xf32> -> vector<8x64xf32>
    %75 = arith.addf %69, %74 : vector<8x64xf32>
    %c0_94 = arith.constant 0 : index
    %c2_95 = arith.constant 2 : index
    %c0_96 = arith.constant 0 : index
    %c0_97 = arith.constant 0 : index
    %76 = vector.load %arg14[%c0_94, %c2_95, %c0_96, %c0_97] : memref<2x4x4x64xf32, #tpu.memory_space<vmem>>, vector<2x2x2x64xf32>
    %77 = vector.shape_cast %76 : vector<2x2x2x64xf32> to vector<8x64xf32>
    %c6 = arith.constant 6 : index
    %c0_98 = arith.constant 0 : index
    %c0_99 = arith.constant 0 : index
    %78 = vector.load %arg6[%c6, %c0_98, %c0_99] : memref<9x64x64xf32, #tpu.memory_space<vmem>>, vector<1x64x64xf32>
    %79 = vector.shape_cast %78 : vector<1x64x64xf32> to vector<64x64xf32>
    %cst_100 = arith.constant dense<0.000000e+00> : vector<8x64xf32>
    %80 = tpu.matmul %77, %79, %cst_100 {dimension_numbers = #tpu.dot_dimension_numbers<[1], [0], [0], [1], [0, 0, 1, 1], [], []>} : vector<8x64xf32>, vector<64x64xf32>, vector<8x64xf32> -> vector<8x64xf32>
    %81 = arith.addf %75, %80 : vector<8x64xf32>
    %c0_101 = arith.constant 0 : index
    %c2_102 = arith.constant 2 : index
    %c1_103 = arith.constant 1 : index
    %c0_104 = arith.constant 0 : index
    %82 = vector.load %arg14[%c0_101, %c2_102, %c1_103, %c0_104] : memref<2x4x4x64xf32, #tpu.memory_space<vmem>>, vector<2x2x2x64xf32>
    %83 = vector.shape_cast %82 : vector<2x2x2x64xf32> to vector<8x64xf32>
    %c7 = arith.constant 7 : index
    %c0_105 = arith.constant 0 : index
    %c0_106 = arith.constant 0 : index
    %84 = vector.load %arg6[%c7, %c0_105, %c0_106] : memref<9x64x64xf32, #tpu.memory_space<vmem>>, vector<1x64x64xf32>
    %85 = vector.shape_cast %84 : vector<1x64x64xf32> to vector<64x64xf32>
    %cst_107 = arith.constant dense<0.000000e+00> : vector<8x64xf32>
    %86 = tpu.matmul %83, %85, %cst_107 {dimension_numbers = #tpu.dot_dimension_numbers<[1], [0], [0], [1], [0, 0, 1, 1], [], []>} : vector<8x64xf32>, vector<64x64xf32>, vector<8x64xf32> -> vector<8x64xf32>
    %87 = arith.addf %81, %86 : vector<8x64xf32>
    %c0_108 = arith.constant 0 : index
    %c2_109 = arith.constant 2 : index
    %c2_110 = arith.constant 2 : index
    %c0_111 = arith.constant 0 : index
    %88 = vector.load %arg14[%c0_108, %c2_109, %c2_110, %c0_111] : memref<2x4x4x64xf32, #tpu.memory_space<vmem>>, vector<2x2x2x64xf32>
    %89 = vector.shape_cast %88 : vector<2x2x2x64xf32> to vector<8x64xf32>
    %c8 = arith.constant 8 : index
    %c0_112 = arith.constant 0 : index
    %c0_113 = arith.constant 0 : index
    %90 = vector.load %arg6[%c8, %c0_112, %c0_113] : memref<9x64x64xf32, #tpu.memory_space<vmem>>, vector<1x64x64xf32>
    %91 = vector.shape_cast %90 : vector<1x64x64xf32> to vector<64x64xf32>
    %cst_114 = arith.constant dense<0.000000e+00> : vector<8x64xf32>
    %92 = tpu.matmul %89, %91, %cst_114 {dimension_numbers = #tpu.dot_dimension_numbers<[1], [0], [0], [1], [0, 0, 1, 1], [], []>} : vector<8x64xf32>, vector<64x64xf32>, vector<8x64xf32> -> vector<8x64xf32>
    %93 = arith.addf %87, %92 : vector<8x64xf32>
    %c0_115 = arith.constant 0 : index
    %c0_116 = arith.constant 0 : index
    %94 = vector.load %arg7[%c0_115, %c0_116] : memref<1x64xf32, #tpu.memory_space<vmem>>, vector<1x64xf32>
    %95 = vector.broadcast %94 : vector<1x64xf32> to vector<8x64xf32>
    %96 = arith.addf %93, %95 : vector<8x64xf32>
    %cst_117 = arith.constant 0.000000e+00 : f32
    %97 = vector.broadcast %cst_117 : f32 to vector<8x64xf32>
    %98 = arith.maximumf %96, %97 : vector<8x64xf32>
    %99 = vector.shape_cast %98 : vector<8x64xf32> to vector<2x4x64xf32>
    %c0_118 = arith.constant 0 : index
    %c0_119 = arith.constant 0 : index
    %c0_120 = arith.constant 0 : index
    %100 = vector.load %arg15[%c0_118, %c0_119, %c0_120] : memref<2x4x64xf32, #tpu.memory_space<vmem>>, vector<2x4x64xf32>
    tpu.vector_store %arg15[%c0_118, %c0_119, %c0_120], %99 {strides = array<i32>} : memref<2x4x64xf32, #tpu.memory_space<vmem>>, vector<2x4x64xf32>,
    %c0_121 = arith.constant 0 : index
    %c0_122 = arith.constant 0 : index
    %c0_123 = arith.constant 0 : index
    %101 = vector.load %arg15[%c0_121, %c0_122, %c0_123] : memref<2x4x64xf32, #tpu.memory_space<vmem>>, vector<2x1x64xf32>
    %102 = vector.shape_cast %101 : vector<2x1x64xf32> to vector<2x64xf32>
    %c0_124 = arith.constant 0 : index
    %c0_125 = arith.constant 0 : index
    %103 = vector.load %arg8[%c0_124, %c0_125] : memref<256x512xf32, #tpu.memory_space<vmem>>, vector<64x512xf32>
    %cst_126 = arith.constant dense<0.000000e+00> : vector<2x512xf32>
    %104 = tpu.matmul %102, %103, %cst_126 {dimension_numbers = #tpu.dot_dimension_numbers<[1], [0], [0], [1], [0, 0, 1, 1], [], []>} : vector<2x64xf32>, vector<64x512xf32>, vector<2x512xf32> -> vector<2x512xf32>
    %c0_127 = arith.constant 0 : index
    %c1_128 = arith.constant 1 : index
    %c0_129 = arith.constant 0 : index
    %105 = vector.load %arg15[%c0_127, %c1_128, %c0_129] : memref<2x4x64xf32, #tpu.memory_space<vmem>>, vector<2x1x64xf32>
    %106 = vector.shape_cast %105 : vector<2x1x64xf32> to vector<2x64xf32>
    %c64 = arith.constant 64 : index
    %c0_130 = arith.constant 0 : index
    %107 = vector.load %arg8[%c64, %c0_130] : memref<256x512xf32, #tpu.memory_space<vmem>>, vector<64x512xf32>
    %cst_131 = arith.constant dense<0.000000e+00> : vector<2x512xf32>
    %108 = tpu.matmul %106, %107, %cst_131 {dimension_numbers = #tpu.dot_dimension_numbers<[1], [0], [0], [1], [0, 0, 1, 1], [], []>} : vector<2x64xf32>, vector<64x512xf32>, vector<2x512xf32> -> vector<2x512xf32>
    %109 = arith.addf %104, %108 : vector<2x512xf32>
    %c0_132 = arith.constant 0 : index
    %c2_133 = arith.constant 2 : index
    %c0_134 = arith.constant 0 : index
    %110 = vector.load %arg15[%c0_132, %c2_133, %c0_134] : memref<2x4x64xf32, #tpu.memory_space<vmem>>, vector<2x1x64xf32>
    %111 = vector.shape_cast %110 : vector<2x1x64xf32> to vector<2x64xf32>
    %c128 = arith.constant 128 : index
    %c0_135 = arith.constant 0 : index
    %112 = vector.load %arg8[%c128, %c0_135] : memref<256x512xf32, #tpu.memory_space<vmem>>, vector<64x512xf32>
    %cst_136 = arith.constant dense<0.000000e+00> : vector<2x512xf32>
    %113 = tpu.matmul %111, %112, %cst_136 {dimension_numbers = #tpu.dot_dimension_numbers<[1], [0], [0], [1], [0, 0, 1, 1], [], []>} : vector<2x64xf32>, vector<64x512xf32>, vector<2x512xf32> -> vector<2x512xf32>
    %114 = arith.addf %109, %113 : vector<2x512xf32>
    %c0_137 = arith.constant 0 : index
    %c3_138 = arith.constant 3 : index
    %c0_139 = arith.constant 0 : index
    %115 = vector.load %arg15[%c0_137, %c3_138, %c0_139] : memref<2x4x64xf32, #tpu.memory_space<vmem>>, vector<2x1x64xf32>
    %116 = vector.shape_cast %115 : vector<2x1x64xf32> to vector<2x64xf32>
    %c192 = arith.constant 192 : index
    %c0_140 = arith.constant 0 : index
    %117 = vector.load %arg8[%c192, %c0_140] : memref<256x512xf32, #tpu.memory_space<vmem>>, vector<64x512xf32>
    %cst_141 = arith.constant dense<0.000000e+00> : vector<2x512xf32>
    %118 = tpu.matmul %116, %117, %cst_141 {dimension_numbers = #tpu.dot_dimension_numbers<[1], [0], [0], [1], [0, 0, 1, 1], [], []>} : vector<2x64xf32>, vector<64x512xf32>, vector<2x512xf32> -> vector<2x512xf32>
    %119 = arith.addf %114, %118 : vector<2x512xf32>
    %c0_142 = arith.constant 0 : index
    %c0_143 = arith.constant 0 : index
    %120 = vector.load %arg9[%c0_142, %c0_143] : memref<1x512xf32, #tpu.memory_space<vmem>>, vector<1x512xf32>
    %121 = vector.broadcast %120 : vector<1x512xf32> to vector<2x512xf32>
    %122 = arith.addf %119, %121 : vector<2x512xf32>
    %cst_144 = arith.constant 0.000000e+00 : f32
    %123 = vector.broadcast %cst_144 : f32 to vector<2x512xf32>
    %124 = arith.maximumf %122, %123 : vector<2x512xf32>
    %c0_145 = arith.constant 0 : index
    %c0_146 = arith.constant 0 : index
    %125 = vector.load %arg10[%c0_145, %c0_146] : memref<512x128xf32, #tpu.memory_space<vmem>>, vector<512x128xf32>
    %cst_147 = arith.constant dense<0.000000e+00> : vector<2x128xf32>
    %126 = tpu.matmul %124, %125, %cst_147 {dimension_numbers = #tpu.dot_dimension_numbers<[1], [0], [0], [1], [0, 0, 1, 1], [], []>} : vector<2x512xf32>, vector<512x128xf32>, vector<2x128xf32> -> vector<2x128xf32>
    %c0_148 = arith.constant 0 : index
    %c0_149 = arith.constant 0 : index
    %127 = vector.load %arg11[%c0_148, %c0_149] : memref<1x128xf32, #tpu.memory_space<vmem>>, vector<1x128xf32>
    %128 = vector.broadcast %127 : vector<1x128xf32> to vector<2x128xf32>
    %129 = arith.addf %126, %128 : vector<2x128xf32>
    %130 = vector.shape_cast %129 : vector<2x128xf32> to vector<1x2x128xf32>
    %c0_150 = arith.constant 0 : index
    %c0_151 = arith.constant 0 : index
    %c0_152 = arith.constant 0 : index
    %131 = vector.load %arg12[%c0_150, %c0_151, %c0_152] : memref<1x2x128xf32, #tpu.memory_space<vmem>>, vector<1x2x128xf32>
    tpu.vector_store %arg12[%c0_150, %c0_151, %c0_152], %130 {strides = array<i32>} : memref<1x2x128xf32, #tpu.memory_space<vmem>>, vector<1x2x128xf32>,
    return
  }
  func.func @transform_0(%arg0: i32) -> (i32, i32, i32, i32) {
    %c0_i32 = arith.constant 0 : i32
    %c0_i32_0 = arith.constant 0 : i32
    %c0_i32_1 = arith.constant 0 : i32
    %c0_i32_2 = arith.constant 0 : i32
    return %arg0, %c0_i32, %c0_i32_0, %c0_i32_1 : i32, i32, i32, i32
  }
  func.func @transform_1(%arg0: i32) -> (i32, i32) {
    %c0_i32 = arith.constant 0 : i32
    %c0_i32_0 = arith.constant 0 : i32
    %c0_i32_1 = arith.constant 0 : i32
    return %c0_i32, %c0_i32_0 : i32, i32
  }
  func.func @transform_2(%arg0: i32) -> (i32, i32) {
    %c0_i32 = arith.constant 0 : i32
    %c0_i32_0 = arith.constant 0 : i32
    %c0_i32_1 = arith.constant 0 : i32
    return %c0_i32, %c0_i32_0 : i32, i32
  }
  func.func @transform_3(%arg0: i32) -> (i32, i32, i32) {
    %c0_i32 = arith.constant 0 : i32
    %c0_i32_0 = arith.constant 0 : i32
    %c0_i32_1 = arith.constant 0 : i32
    %c0_i32_2 = arith.constant 0 : i32
    return %c0_i32, %c0_i32_0, %c0_i32_1 : i32, i32, i32
  }
  func.func @transform_4(%arg0: i32) -> (i32, i32) {
    %c0_i32 = arith.constant 0 : i32
    %c0_i32_0 = arith.constant 0 : i32
    %c0_i32_1 = arith.constant 0 : i32
    return %c0_i32, %c0_i32_0 : i32, i32
  }
  func.func @transform_5(%arg0: i32) -> (i32, i32, i32) {
    %c0_i32 = arith.constant 0 : i32
    %c0_i32_0 = arith.constant 0 : i32
    %c0_i32_1 = arith.constant 0 : i32
    %c0_i32_2 = arith.constant 0 : i32
    return %c0_i32, %c0_i32_0, %c0_i32_1 : i32, i32, i32
  }
  func.func @transform_6(%arg0: i32) -> (i32, i32) {
    %c0_i32 = arith.constant 0 : i32
    %c0_i32_0 = arith.constant 0 : i32
    %c0_i32_1 = arith.constant 0 : i32
    return %c0_i32, %c0_i32_0 : i32, i32
  }
  func.func @transform_7(%arg0: i32) -> (i32, i32) {
    %c0_i32 = arith.constant 0 : i32
    %c0_i32_0 = arith.constant 0 : i32
    %c0_i32_1 = arith.constant 0 : i32
    return %c0_i32, %c0_i32_0 : i32, i32
  }
  func.func @transform_8(%arg0: i32) -> (i32, i32) {
    %c0_i32 = arith.constant 0 : i32
    %c0_i32_0 = arith.constant 0 : i32
    %c0_i32_1 = arith.constant 0 : i32
    return %c0_i32, %c0_i32_0 : i32, i32
  }
  func.func @transform_9(%arg0: i32) -> (i32, i32) {
    %c0_i32 = arith.constant 0 : i32
    %c0_i32_0 = arith.constant 0 : i32
    %c0_i32_1 = arith.constant 0 : i32
    return %c0_i32, %c0_i32_0 : i32, i32
  }
  func.func @transform_10(%arg0: i32) -> (i32, i32) {
    %c0_i32 = arith.constant 0 : i32
    %c0_i32_0 = arith.constant 0 : i32
    %c0_i32_1 = arith.constant 0 : i32
    return %c0_i32, %c0_i32_0 : i32, i32
  }
  func.func @transform_11(%arg0: i32) -> (i32, i32, i32) {
    %c0_i32 = arith.constant 0 : i32
    %c0_i32_0 = arith.constant 0 : i32
    %c0_i32_1 = arith.constant 0 : i32
    return %arg0, %c0_i32, %c0_i32_0 : i32, i32, i32
  }
}

</mosaic_0001>

<bundles_post_ra>
// kernel: tile.8
= control target key start
LH: loop header
LB: loop body
LE: loop exit
PB: predicated region body
PF: predicated region fallthrough
CT: control target
= control target key end

     0   :  { %s22_s0 = inlined_call_operand.vmem [shape: f32[32], index: 0, kind: input, shape index: {}]   ;;  %s23_s1 = inlined_call_operand.vmem [shape: f32[4,32], index: 1, kind: output, shape index: {}]  }
   0x1   :  { %v4_v0 = vld [vmem:[%s22_s0] ss:$0 sm:$0xff] }
   0x2   :  { %5 = vst [vmem:[%s23_s1] sm:$0xf] %v4_v0 }

// kernel: tile.9
= control target key start
LH: loop header
LB: loop body
LE: loop exit
PB: predicated region body
PF: predicated region fallthrough
CT: control target
= control target key end

     0   :  { %vm7_vm0 = vcmask 261120   ;;  %s37_s8 = smov 32   ;;  %s38_s9 = smov 64   ;;  %vm13_vm1 = vcmask 1048320   ;;  %vm19_vm2 = vcmask 785920   ;;  %vm25_vm3 = vcmask 523520   ;;  %s55_s0 = inlined_call_operand.vmem [shape: f32[4,32], index: 0, kind: input, shape index: {}]   ;;  %s56_s1 = inlined_call_operand.vmem [shape: f32[1,128], index: 1, kind: output, shape index: {}]  }
   0x1   :  { %v4_v0 = vld [vmem:[%s55_s0] sm:$0xf]  ;;  %s36_s0 = smov 96  }
   0x2   :  { %5 = vst [vmem:[#allocation1] sm:$0xf] %v4_v0 }
   0x9   :  { %v10_v1 = vld [vmem:[#allocation1 + $0x3] sm:$0x1]   ;;  %v22_v2 = vld [vmem:[#allocation1 + $0x1] sm:$0x1]   ;;  %v6_v3 = vld [vmem:[#allocation1] sm:$0x1]  }
   0xa   :  { %11 = vrot.lane.b32.xlu0 %v10_v1, %s36_s0  ;;  %23 = vrot.lane.b32.xlu1 %v22_v2, %s37_s8  ;;  %v16_v4 = vld [vmem:[#allocation1 + $0x2] sm:$0x1]   ;;  %8 = vst.msk [vmem:[#allocation0] sm:$0x1] %vm7_vm0, %v6_v3  }
   0xe   :  { %17 = vrot.lane.b32.xlu0 %v16_v4, %s38_s9 }
  0x7c   :  { %v12_v5 = vpop.permute.xlu0 %11   ;;  %v24_v6 = vpop.permute.xlu1 %23  }
  0x7d   :  { %14 = vst.msk [vmem:[#allocation0] sm:$0x1] %vm13_vm1, %v12_v5  }
  0x80   :  { %v18_v7 = vpop.permute.xlu0 %17  }
  0x81   :  { %20 = vst.msk [vmem:[#allocation0] sm:$0x1] %vm19_vm2, %v18_v7  }
  0x82   :  { %26 = vst.msk [vmem:[#allocation0] sm:$0x1] %vm25_vm3, %v24_v6  }
  0x89   :  { %v30_v8 = vld [vmem:[#allocation0] sm:$0x1] }
  0x8a   :  { %32 = vst [vmem:[%s56_s1] sm:$0x1] %v30_v8 }

// kernel: dqn_forward_pallas.1
= control target key start
LH: loop header
LB: loop body
LE: loop exit
PB: predicated region body
PF: predicated region fallthrough
CT: control target
= control target key end

     0   :  { %s5962_s17 = smov 0   ;;  %s7451_s0 = inlined_call_operand.vmem [shape: f32[2,2,25,144], index: 0, kind: input, shape index: {}]   ;;  %s7452_s1 = inlined_call_operand.vmem [shape: f32[144,128], index: 1, kind: input, shape index: {}]   ;;  %s7453_s2 = inlined_call_operand.vmem [shape: f32[1,128], index: 2, kind: input, shape index: {}]   ;;  %s7454_s3 = inlined_call_operand.vmem [shape: f32[4,128,64], index: 3, kind: input, shape index: {}]   ;;  %s7455_s4 = inlined_call_operand.vmem [shape: f32[1,64], index: 4, kind: input, shape index: {}]   ;;  %s7456_s5 = inlined_call_operand.vmem [shape: f32[9,64,64], index: 5, kind: input, shape index: {}]   ;;  %s7457_s6 = inlined_call_operand.vmem [shape: f32[1,64], index: 6, kind: input, shape index: {}]   ;;  %s7458_s7 = inlined_call_operand.vmem [shape: f32[256,512], index: 7, kind: input, shape index: {}]   ;;  %s7459_s8 = inlined_call_operand.vmem [shape: f32[1,512], index: 8, kind: input, shape index: {}]   ;;  %s7460_s9 = inlined_call_operand.vmem [shape: f32[512,128], index: 9, kind: input, shape index: {}]   ;;  %s7461_s10 = inlined_call_operand.vmem [shape: f32[1,128], index: 10, kind: input, shape index: {}]   ;;  %s7462_s11 = inlined_call_operand.vmem [shape: f32[2,2,128], index: 11, kind: output, shape index: {}]  }
   0x1 LB: > { %s4610_s18 = sadd.s32 4294967295, %s5896_s17   ;;  %p4614_p0 = scmp.ge.s32.totalorder %s5896_s17, 1  ;;  %s5896_s17 = sphi %s5962_s17, %s21_s17  }
   0x2   : > { %p337_p1 = scmp.lt.s32.totalorder %s5896_s17, 3 }
   0x4   : > { %p338_p2 = pnand %p4614_p0, %p337_p1 }
   0x5   : > { %v747_v0 = vld [vmem:[%s7452_s1] sm:$0xff] (!%p338_p2)  ;;  %v748_v1 = vld [vmem:[%s7452_s1 + $0x8] sm:$0xff] (!%p338_p2)  ;;  %v749_v2 = vld [vmem:[%s7452_s1 + $0x10] sm:$0xff] (!%p338_p2)  ;;  %p376_p3 = scmp.lt.s32.totalorder (!%p338_p2), %s4610_s18, 1  ;;  %v422_v3 = vlaneseq (!%p338_p2)  ;;  %v5898_v4 = vmov (!%p338_p2), 0.0|0.0   ;;  %vm1198_vm0 = vcmask (!%p338_p2), 130048  }
   0x6   : > { %341 = sbr.rel (%p338_p2) target bundleno = 1441 (0x5a1), region = 64  ;;  %5326 = vmatprep.subr.bf16.mxu0 (!%p338_p2), %v5898_v4  ;;  %v5327_v5 = vpack.c.bf16 (!%p338_p2), %v748_v1, %v747_v0  ;;  %v750_v6 = vld [vmem:[%s7452_s1 + $0x18] sm:$0xff] (!%p338_p2)  ;;  %v751_v7 = vld [vmem:[%s7452_s1 + $0x20] sm:$0xff] (!%p338_p2)  ;;  %v752_v8 = vld [vmem:[%s7452_s1 + $0x28] sm:$0xff] (!%p338_p2)  ;;  %v5899_v9 = vmov (!%p338_p2), 1966171168  }
   0x7   : > { %v420_v10 = vunpack.c.l.s4 (!%p338_p2), %v5899_v9  ;;  %v5991_v11 = vshrl.u32 (!%p338_p2), %v422_v3, 7  ;;  %v5330_v12 = vpack.c.bf16 (!%p338_p2), %v750_v6, %v749_v2  ;;  %v753_v13 = vld [vmem:[%s7452_s1 + $0x30] sm:$0xff] (!%p338_p2)  ;;  %v754_v14 = vld [vmem:[%s7452_s1 + $0x38] sm:$0xff] (!%p338_p2)  ;;  %v6002_v15 = vld [vmem:[%s7452_s1 + $0x40] sm:$0xff] (!%p338_p2)  ;;  %v5333_v28 = vpack.c.bf16 (!%p338_p2), %v752_v8, %v751_v7 }
   0x8   : > { %5328 = vmatpush1.bf16.msra.mxu0 (!%p338_p2), %v5327_v5  ;;  %v6007_v16 = vld [vmem:[%s7452_s1 + $0x48] sm:$0xff] (!%p338_p2)  ;;  %v6012_v17 = vld [vmem:[%s7452_s1 + $0x50] sm:$0xff] (!%p338_p2)  ;;  %v6017_v18 = vld [vmem:[%s7452_s1 + $0x58] sm:$0xff] (!%p338_p2)  ;;  %v5336_v30 = vpack.c.bf16 (!%p338_p2), %v754_v14, %v753_v13  ;;  %vm5900_vm1 = vmmov (!%p338_p2), 0   ;;  %vm2592_vm2 = vcmask (!%p338_p2), 519168   ;;  %vm2647_vm3 = vcmask (!%p338_p2), 523264  }
   0x9   : > { %5329 = vmatprep.subr.bf16.mxu0 (!%p338_p2), %v5898_v4  ;;  %v6023_v19 = vld [vmem:[%s7452_s1 + $0x60] sm:$0xff] (!%p338_p2)  ;;  %v6028_v20 = vld [vmem:[%s7452_s1 + $0x68] sm:$0xff] (!%p338_p2)  ;;  %v6033_v21 = vld [vmem:[%s7452_s1 + $0x70] sm:$0xff] (!%p338_p2)  ;;  %v421_v22 = vunpack.c.0.s8 (!%p338_p2), %v420_v10  ;;  %v5339_v31 = vpack.c.bf16 (!%p338_p2), %v6007_v16, %v6002_v15  ;;  %v5342_v32 = vpack.c.bf16 (!%p338_p2), %v6017_v18, %v6012_v17  ;;  %vm3649_vm4 = vcmask (!%p338_p2), 1041409  }
   0xa   : > { %v6039_v23 = vld [vmem:[%s7452_s1 + $0x78] sm:$0xff] (!%p338_p2)  ;;  %v6044_v24 = vld [vmem:[%s7452_s1 + $0x80] sm:$0xff] (!%p338_p2)  ;;  %v6049_v25 = vld [vmem:[%s7452_s1 + $0x88] sm:$0xff] (!%p338_p2)  ;;  %v5345_v36 = vpack.c.bf16 (!%p338_p2), %v6028_v20, %v6023_v19 }
   0xb   : > { %v6058_v27 = vsub.s32 (!%p338_p2), %v421_v22, %v5991_v11  ;;  %v5348_v37 = vpack.c.bf16 (!%p338_p2), %v6039_v23, %v6033_v21  ;;  %v5351_v38 = vpack.c.bf16 (!%p338_p2), %v6049_v25, %v6044_v24 }
   0xc   : > { %5331 = vmatpush1.bf16.msra.mxu0 (!%p338_p2), %v5330_v12 }
   0xd   : > { %s7464_s18 = smov (!%p376_p3, %s4610_s18), 1  ;;  %5332 = vmatprep.subr.bf16.mxu0 %v5898_v4 }
   0xe   : > { %s4771_s13 = sshll.u32 %s7464_s18, 7  ;;  %s4617_s28 = sshll.u32 %s7464_s18, 1 }
   0xf   : > { %s6054_s24 = scalar_lea.vmem %s7451_s0, %s4771_s13  ;;  %s384_s12 = scalar_lea.vmem %s7462_s11, %s4617_s28 }
  0x10   : > { %v5818_v26 = vld [vmem:[%s6054_s24] ss:$8 sps:$4 sm:$0xff]   ;;  %v5820_v29 = vld [vmem:[%s6054_s24 + $0x4] ss:$8 sps:$4 sm:$0xff]   ;;  %v5821_v34 = vld [vmem:[%s6054_s24 + $0x10] ss:$8 sps:$4 sm:$0xff]   ;;  %5334 = vmatpush1.bf16.msra.mxu0 %v5333_v28 }
  0x11   : > { %v425_v33 = vrot.slane %v5818_v26, %v6058_v27  ;;  %v5823_v35 = vld [vmem:[%s6054_s24 + $0x14] ss:$8 sps:$4 sm:$0xff]   ;;  %v432_v39 = vrot.slane %v5820_v29, %v6058_v27  ;;  %v5824_v40 = vld [vmem:[%s6054_s24 + $0x20] ss:$8 sps:$4 sm:$0xff]   ;;  %v5826_v41 = vld [vmem:[%s6054_s24 + $0x24] ss:$8 sps:$4 sm:$0xff]   ;;  %v475_v44 = vrot.slane %v5821_v34, %v6058_v27  ;;  %5335 = vmatprep.subr.bf16.mxu0 %v5898_v4 }
  0x12   : > { %v482_v45 = vrot.slane %v5823_v35, %v6058_v27  ;;  %v525_v48 = vrot.slane %v5824_v40, %v6058_v27  ;;  %v532_v49 = vrot.slane %v5826_v41, %v6058_v27  ;;  %v5827_v41 = vld [vmem:[%s6054_s24 + $0x30] ss:$8 sps:$4 sm:$0x11]  }
  0x13   : > { %v433_v42 = vcombine.high %v425_v33, %v425_v33  ;;  %v441_v43 = vrot.slane %v425_v33, %v6058_v27  ;;  %v434_v46 = vcombine.high %v432_v39, %v432_v39  ;;  %v448_v47 = vrot.slane %v432_v39, %v6058_v27 }
  0x14   : > { %v483_v51 = vcombine.high %v475_v44, %v475_v44  ;;  %v484_v52 = vcombine.high %v482_v45, %v482_v45  ;;  %v491_v53 = vrot.slane %v475_v44, %v6058_v27  ;;  %v498_v55 = vrot.slane %v482_v45, %v6058_v27  ;;  %5337 = vmatpush1.bf16.msra.mxu0 %v5336_v30 }
  0x15   : > { %v455_v50 = vrot.slane %v433_v42, %v6058_v27  ;;  %v462_v54 = vrot.slane %v434_v46, %v6058_v27  ;;  %v533_v56 = vcombine.high %v525_v48, %v525_v48  ;;  %v534_v57 = vcombine.high %v532_v49, %v532_v49  ;;  %5338 = vmatprep.subr.bf16.mxu0 %v5898_v4  ;;  %v5828_v42 = vld [vmem:[%s6054_s24 + $0x40] ss:$8 sps:$4 sm:$0xff]  }
  0x16   : > { %v505_v60 = vrot.slane %v483_v51, %v6058_v27  ;;  %v512_v61 = vrot.slane %v484_v52, %v6058_v27  ;;  %v541_v0 = vrot.slane %v525_v48, %v6058_v27  ;;  %v548_v1 = vrot.slane %v532_v49, %v6058_v27  ;;  %v5830_v51 = vld [vmem:[%s6054_s24 + $0x44] ss:$8 sps:$4 sm:$0xff]  }
  0x17   : > { %v772_v58 = vcombine.low %v441_v43, %v455_v50  ;;  %v4619_v59 = vcombine.high %v441_v43, %v455_v50  ;;  %v774_v62 = vcombine.low %v448_v47, %v462_v54  ;;  %v4620_v63 = vcombine.high %v448_v47, %v462_v54 }
  0x18   : > { %v838_v5 = vcombine.low %v491_v53, %v505_v60  ;;  %v4621_v6 = vcombine.high %v491_v53, %v505_v60  ;;  %v840_v9 = vcombine.low %v498_v55, %v512_v61  ;;  %v4622_v10 = vcombine.high %v498_v55, %v512_v61  ;;  %5340 = vmatpush1.bf16.msra.mxu0 %v5339_v31 }
  0x19   : > { %v782_v2 = vrot.slane %v772_v58, %v6058_v27  ;;  %v789_v3 = vrot.slane %v4619_v59, %v6058_v27  ;;  %v796_v7 = vrot.slane %v774_v62, %v6058_v27  ;;  %v803_v8 = vrot.slane %v4620_v63, %v6058_v27  ;;  %5341 = vmatprep.subr.bf16.mxu0 %v5898_v4 }
  0x1a   : > { %v848_v14 = vrot.slane %v838_v5, %v6058_v27  ;;  %v855_v15 = vrot.slane %v4621_v6, %v6058_v27  ;;  %v862_v26 = vrot.slane %v840_v9, %v6058_v27  ;;  %v869_v28 = vrot.slane %v4622_v10, %v6058_v27  ;;  %v5831_v6 = vld [vmem:[%s6054_s24 + $0x50] ss:$8 sps:$4 sm:$0xff]  }
  0x1b   : > { %v805_v12 = vcombine.high %v782_v2, %v789_v3  ;;  %v804_v13 = vcombine.low %v782_v2, %v789_v3  ;;  %v807_v16 = vcombine.high %v796_v7, %v803_v8  ;;  %v806_v22 = vcombine.low %v796_v7, %v803_v8 }
  0x1c   : > { %v871_v33 = vcombine.high %v848_v14, %v855_v15  ;;  %v870_v34 = vcombine.low %v848_v14, %v855_v15  ;;  %v873_v39 = vcombine.high %v862_v26, %v869_v28  ;;  %v872_v40 = vcombine.low %v862_v26, %v869_v28  ;;  %5343 = vmatpush1.bf16.msra.mxu0 %v5342_v32  ;;  %v5834_v26 = vld [vmem:[%s6054_s24 + $0x60] ss:$8 sps:$4 sm:$0xff]   ;;  %v5836_v28 = vld [vmem:[%s6054_s24 + $0x64] ss:$8 sps:$4 sm:$0xff]  }
  0x1d   : > { %v821_v29 = vrot.slane %v805_v12, %v6058_v27  ;;  %v6105_v30 = vrot.slane %v804_v13, %v6058_v27  ;;  %v835_v35 = vrot.slane %v807_v16, %v6058_v27  ;;  %v6109_v31 = vrot.slane %v806_v22, %v6058_v27  ;;  %5344 = vmatprep.subr.bf16.mxu0 %v5898_v4  ;;  %v5833_v13 = vld [vmem:[%s6054_s24 + $0x54] ss:$8 sps:$4 sm:$0xff]  }
  0x1e   : > { %v6114_v43 = vrot.slane %v871_v33, %v6058_v27  ;;  %v6117_v44 = vrot.slane %v870_v34, %v6058_v27  ;;  %v555_v45 = vrot.slane %v533_v56, %v6058_v27  ;;  %v562_v46 = vrot.slane %v534_v57, %v6058_v27 }
  0x1f   : > { %v837_v47 = vcombine.low %v821_v29, %v835_v35  ;;  %v836_v48 = vcombine.low %v6105_v30, %v6109_v31  ;;  %v6127_v49 = vrot.slane %v873_v39, %v6058_v27  ;;  %v6130_v50 = vrot.slane %v872_v40, %v6058_v27  ;;  %v5837_v30 = vld [vmem:[%s6054_s24 + $0x70] ss:$8 sps:$4 sm:$0x11]  }
  0x20   : > { %v904_v52 = vcombine.low %v541_v0, %v555_v45  ;;  %v4623_v53 = vcombine.high %v541_v0, %v555_v45  ;;  %v906_v54 = vcombine.low %v548_v1, %v562_v46  ;;  %v4624_v55 = vcombine.high %v548_v1, %v562_v46  ;;  %5346 = vmatpush1.bf16.msra.mxu0 %v5345_v36 }
  0x21   : > { %4625 = vmatprep.mubr.msk.f32.mxu0 %vm1198_vm0, %v837_v47  ;;  %v903_v17 = vcombine.low %v6114_v43, %v6127_v49  ;;  %v902_v18 = vcombine.low %v6117_v44, %v6130_v50  ;;  %v574_v32 = vrot.slane %v5827_v41, %v6058_v27  ;;  %v590_v56 = vrot.slane %v5828_v42, %v6058_v27 }
  0x22   : > { %v914_v57 = vrot.slane %v904_v52, %v6058_v27  ;;  %v921_v58 = vrot.slane %v4623_v53, %v6058_v27  ;;  %v928_v59 = vrot.slane %v906_v54, %v6058_v27  ;;  %v935_v60 = vrot.slane %v4624_v55, %v6058_v27  ;;  %5347 = vmatprep.subr.bf16.mxu0 %v5898_v4 }
  0x23   : > { %v581_v61 = vrot.slane %v574_v32, %v6058_v27  ;;  %v597_v62 = vrot.slane %v5830_v51, %v6058_v27  ;;  %v598_v63 = vcombine.high %v590_v56, %v590_v56  ;;  %v606_v0 = vrot.slane %v590_v56, %v6058_v27 }
  0x24   : > { %v937_v1 = vcombine.high %v914_v57, %v921_v58  ;;  %v939_v2 = vcombine.high %v928_v59, %v935_v60  ;;  %v936_v3 = vcombine.low %v914_v57, %v921_v58  ;;  %v938_v5 = vcombine.low %v928_v59, %v935_v60  ;;  %5349 = vmatpush1.bf16.msra.mxu0 %v5348_v37 }
  0x25   : > { %v599_v7 = vcombine.high %v597_v62, %v597_v62  ;;  %v613_v19 = vrot.slane %v597_v62, %v6058_v27  ;;  %v620_v20 = vrot.slane %v598_v63, %v6058_v27  ;;  %v628_v36 = vcombine.high %v606_v0, %v606_v0  ;;  %5350 = vmatprep.subr.bf16.mxu0 %v5898_v4 }
  0x26   : > { %v6156_v8 = vrot.slane %v937_v1, %v6058_v27  ;;  %v6159_v9 = vrot.slane %v939_v2, %v6058_v27  ;;  %v6162_v10 = vrot.slane %v936_v3, %v6058_v27  ;;  %v6165_v12 = vrot.slane %v938_v5, %v6058_v27 }
  0x27   : > { %v627_v14 = vrot.slane %v599_v7, %v6058_v27  ;;  %v629_v15 = vcombine.high %v613_v19, %v613_v19  ;;  %v630_v16 = vcombine.high %v620_v20, %v620_v20  ;;  %v970_v22 = vcombine.low %v581_v61, %v606_v0 }
  0x28   : > { %v969_v29 = vcombine.low %v6156_v8, %v6159_v9  ;;  %v968_v33 = vcombine.low %v6162_v10, %v6165_v12  ;;  %v971_v34 = vcombine.low %v620_v20, %v628_v36  ;;  %v640_v35 = vrot.slane %v5831_v6, %v6058_v27  ;;  %5352 = vmatpush1.bf16.msra.mxu0 %v5351_v38 }
  0x29   : > { %v972_v21 = vcombine.low %v630_v16, %v613_v19  ;;  %v973_v23 = vcombine.low %v627_v14, %v629_v15  ;;  %v980_v37 = vrot.slane %v970_v22, %v6058_v27  ;;  %v631_v39 = vcombine.high %v627_v14, %v627_v14  ;;  %5481 = vmatprep.subr.bf16.mxu0 %v5898_v4 }
  0x2a   : > { %v987_v40 = vrot.slane %v971_v34, %v6058_v27  ;;  %v647_v41 = vrot.slane %v5833_v13, %v6058_v27  ;;  %v648_v42 = vcombine.high %v640_v35, %v640_v35  ;;  %v656_v45 = vrot.slane %v640_v35, %v6058_v27 }
  0x2b   : > { %v994_v46 = vrot.slane %v972_v21, %v6058_v27  ;;  %v1001_v47 = vrot.slane %v973_v23, %v6058_v27  ;;  %v690_v51 = vrot.slane %v5834_v26, %v6058_v27  ;;  %v697_v52 = vrot.slane %v5836_v28, %v6058_v27  ;;  %1278 = vmatmul.mubr.f32.vlgmr.msra.gmra.mrb[0].mxu0 %v836_v48 }
  0x2c   : > { %v1003_v53 = vcombine.high %v980_v37, %v987_v40  ;;  %v1002_v54 = vcombine.low %v980_v37, %v987_v40  ;;  %v649_v55 = vcombine.high %v647_v41, %v647_v41  ;;  %v663_v32 = vrot.slane %v647_v41, %v6058_v27  ;;  %4626 = vmatprep.mubr.msk.f32.mxu0 %vm1198_vm0, %v903_v17 }
  0x2d   : > { %v1005_v56 = vcombine.high %v994_v46, %v1001_v47  ;;  %v1004_v57 = vcombine.low %v994_v46, %v1001_v47  ;;  %v670_v24 = vrot.slane %v648_v42, %v6058_v27  ;;  %v678_v25 = vcombine.high %v656_v45, %v656_v45 }
  0x2e   : > { %v1019_v38 = vrot.slane %v1003_v53, %v6058_v27  ;;  %v1012_v58 = vrot.slane %v1002_v54, %v6058_v27  ;;  %v677_v59 = vrot.slane %v649_v55, %v6058_v27  ;;  %v679_v60 = vcombine.high %v663_v32, %v663_v32 }
  0x2f   : > { %v1033_v61 = vrot.slane %v1005_v56, %v6058_v27  ;;  %v1026_v62 = vrot.slane %v1004_v57, %v6058_v27  ;;  %v680_v63 = vcombine.high %v670_v24, %v670_v24  ;;  %v1036_v0 = vcombine.low %v631_v39, %v656_v45  ;;  %1283 = vmatmul.mubr.f32.gmra.mrb[2].mxu0 %v902_v18 }
  0x30   : > { %v1037_v31 = vcombine.low %v670_v24, %v678_v25  ;;  %v1039_v48 = vcombine.low %v677_v59, %v679_v60  ;;  %v681_v1 = vcombine.high %v677_v59, %v677_v59  ;;  %v698_v2 = vcombine.high %v690_v51, %v690_v51  ;;  %4627 = vmatprep.mubr.msk.f32.mxu0 %vm1198_vm0, %v969_v29  ;;  %v4637_v60 = vld [vmem:[%s7454_s3 + $0x80] sm:$0xff] }
  0x31   : > { %v1035_v3 = vcombine.low %v1019_v38, %v1033_v61  ;;  %v1034_v5 = vcombine.low %v1012_v58, %v1026_v62  ;;  %v1038_v6 = vcombine.low %v680_v63, %v663_v32  ;;  %v1046_v7 = vrot.slane %v1036_v0, %v6058_v27  ;;  %v4638_v61 = vld [vmem:[%s7454_s3 + $0x88] sm:$0xff]  ;;  %v4639_v63 = vld [vmem:[%s7454_s3 + $0x90] sm:$0xff]  ;;  %v4640_v0 = vld [vmem:[%s7454_s3 + $0x98] sm:$0xff] }
  0x32   : > { %v1053_v43 = vrot.slane %v1037_v31, %v6058_v27  ;;  %v1067_v49 = vrot.slane %v1039_v48, %v6058_v27  ;;  %v699_v17 = vcombine.high %v697_v52, %v697_v52  ;;  %v706_v19 = vrot.slane %v690_v51, %v6058_v27  ;;  %v4641_v31 = vld [vmem:[%s7454_s3 + $0xa0] sm:$0xff]  ;;  %v4642_v48 = vld [vmem:[%s7454_s3 + $0xa8] sm:$0xff] }
  0x33   : > { %v1060_v20 = vrot.slane %v1038_v6, %v6058_v27  ;;  %v713_v36 = vrot.slane %v697_v52, %v6058_v27  ;;  %v720_v8 = vrot.slane %v698_v2, %v6058_v27  ;;  %v739_v9 = vrot.slane %v5837_v30, %v6058_v27  ;;  %1288 = vmatmul.mubr.f32.gmra.mrb[4].mxu0 %v968_v33  ;;  %v4643_v2 = vld [vmem:[%s7454_s3 + $0xb0] sm:$0xff]  ;;  %v4645_v6 = vld [vmem:[%s7454_s3 + $0xc0] sm:$0xff] }
  0x34   : > { %v1069_v10 = vcombine.high %v1046_v7, %v1053_v43  ;;  %v1068_v44 = vcombine.low %v1046_v7, %v1053_v43  ;;  %v727_v50 = vrot.slane %v699_v17, %v6058_v27  ;;  %v728_v18 = vcombine.high %v706_v19, %v706_v19  ;;  %4628 = vmatprep.mubr.msk.f32.mxu0 %vm1198_vm0, %v1035_v3  ;;  %v4644_v3 = vld [vmem:[%s7454_s3 + $0xb8] sm:$0xff]  ;;  %v4646_v7 = vld [vmem:[%s7454_s3 + $0xc8] sm:$0xff] }
  0x35   : > { %v1071_v12 = vcombine.high %v1060_v20, %v1067_v49  ;;  %v1070_v13 = vcombine.low %v1060_v20, %v1067_v49  ;;  %v729_v14 = vcombine.high %v713_v36, %v713_v36  ;;  %v730_v15 = vcombine.high %v720_v8, %v720_v8  ;;  %v4647_v49 = vld [vmem:[%s7454_s3 + $0xd0] sm:$0xff]  ;;  %v4648_v17 = vld [vmem:[%s7454_s3 + $0xd8] sm:$0xff]  ;;  %v4649_v20 = vld [vmem:[%s7454_s3 + $0xe0] sm:$0xff] }
  0x36   : > { %v1085_v16 = vrot.slane %v1069_v10, %v6058_v27  ;;  %v1078_v22 = vrot.slane %v1068_v44, %v6058_v27  ;;  %v1102_v26 = vcombine.low %v681_v1, %v706_v19  ;;  %v1103_v28 = vcombine.low %v720_v8, %v728_v18  ;;  %v4652_v10 = vld [vmem:[%s7454_s3 + $0xf8] sm:$0xff]  ;;  %v2062_v18 = vld [vmem:[%s7454_s3 + $0x8] sm:$0xff] }
  0x37   : > { %v1099_v29 = vrot.slane %v1071_v12, %v6058_v27  ;;  %v1092_v34 = vrot.slane %v1070_v13, %v6058_v27  ;;  %v1104_v35 = vcombine.low %v730_v15, %v713_v36  ;;  %v1105_v21 = vcombine.low %v727_v50, %v729_v14  ;;  %1293 = vmatmul.mubr.f32.gmra.mrb[6].mxu0 %v1034_v5  ;;  %v4650_v36 = vld [vmem:[%s7454_s3 + $0xe8] sm:$0xff]  ;;  %v6300_v13 = vld [vmem:[%s7453_s2] ss:$0 sm:$0xff] }
  0x38   : > { %v1112_v23 = vrot.slane %v1102_v26, %v6058_v27  ;;  %v1119_v37 = vrot.slane %v1103_v28, %v6058_v27  ;;  %v731_v39 = vcombine.high %v727_v50, %v727_v50  ;;  %v746_v33 = vrot.slane %v739_v9, %v6058_v27  ;;  %v4651_v9 = vld [vmem:[%s7454_s3 + $0xf0] sm:$0xff]  ;;  %v2061_v50 = vld [vmem:[%s7454_s3] sm:$0xff] }
  0x39   : > { %v1101_v40 = vcombine.low %v1085_v16, %v1099_v29  ;;  %v1126_v41 = vrot.slane %v1104_v35, %v6058_v27  ;;  %v1133_v42 = vrot.slane %v1105_v21, %v6058_v27  ;;  %v1100_v45 = vcombine.low %v1078_v22, %v1092_v34 }
  0x3a   : > { %v1135_v46 = vcombine.high %v1112_v23, %v1119_v37  ;;  %v1134_v47 = vcombine.low %v1112_v23, %v1119_v37  ;;  %v1168_v51 = vcombine.low %v731_v39, %v746_v33  ;;  %v5353_v62 = vpack.c.bf16 %v4638_v61, %v4637_v60  ;;  %v2063_v39 = vld [vmem:[%s7454_s3 + $0x10] sm:$0xff]  ;;  %v2064_v33 = vld [vmem:[%s7454_s3 + $0x18] sm:$0xff] }
  0x3b   : > { %4629 = vmatprep.mubr.msk.f32.mxu0 %vm1198_vm0, %v1101_v40  ;;  %v1137_v52 = vcombine.high %v1126_v41, %v1133_v42  ;;  %v1136_v53 = vcombine.low %v1126_v41, %v1133_v42  ;;  %v5357_v30 = vpack.c.bf16 %v4640_v0, %v4639_v63  ;;  %v5361_v1 = vpack.c.bf16 %v4642_v48, %v4641_v31 }
  0x3c   : > { %v1151_v54 = vrot.slane %v1135_v46, %v6058_v27  ;;  %v1144_v55 = vrot.slane %v1134_v47, %v6058_v27  ;;  %v1175_v32 = vrot.slane %v1168_v51, %v6058_v27  ;;  %1298 = vmatmul.mubr.f32.gmra.mrb[8].mxu0 %v1100_v45  ;;  %5354 = vmatprep.subr.bf16.mxu1 %v5353_v62 }
  0x3d   : > { %v1165_v56 = vrot.slane %v1137_v52, %v6058_v27  ;;  %v1158_v57 = vrot.slane %v1136_v53, %v6058_v27  ;;  %5356 = vmatpush3.bf16.msra.mxu1 %v5353_v62  ;;  %v5365_v5 = vpack.c.bf16 %v4644_v3, %v4643_v2  ;;  %v5369_v43 = vpack.c.bf16 %v4646_v7, %v4645_v6 }
  0x3e   : > { %v1176_v24 = vcombine.high %v1175_v32, %v1175_v32  ;;  %v1183_v59 = vrot.slane %v1175_v32, %v6058_v27  ;;  %5358 = vmatprep.subr.bf16.mxu1 %v5357_v30  ;;  %v5373_v19 = vpack.c.bf16 %v4648_v17, %v4647_v49  ;;  %v5377_v8 = vpack.c.bf16 %v4650_v36, %v4649_v20 }
  0x3f   : > { %v1167_v25 = vcombine.low %v1151_v54, %v1165_v56  ;;  %v1166_v38 = vcombine.low %v1144_v55, %v1158_v57  ;;  %v5381_v44 = vpack.c.bf16 %v4652_v10, %v4651_v9  ;;  %v6294_v12 = vpack.c.bf16 %v2062_v18, %v2061_v50 }
  0x40   : > { %v1190_v58 = vrot.slane %v1176_v24, %v6058_v27  ;;  %v6317_v54 = vpack.c.bf16 %v2064_v33, %v2063_v39 }
  0x41   : > { %4630 = vmatprep.mubr.msk.f32.mxu0 %vm1198_vm0, %v1167_v25  ;;  %5360 = vmatpush3.bf16.msra.mxu1 %v5357_v30 }
  0x42   : > { %1303 = vmatmul.mubr.f32.gmra.mrb[10].mxu0 %v1166_v38  ;;  %5362 = vmatprep.subr.bf16.mxu1 %v5361_v1 }
  0x43   : > { %4631 = vmatprep.mubr.msk.f32.mxu0 %vm1198_vm0, %v1190_v58 }
  0x45   : > { %5364 = vmatpush3.bf16.msra.mxu1 %v5361_v1 }
  0x46   : > { %1308 = vmatmul.mubr.f32.gmra.mrb[12].mxu0 %v1183_v59  ;;  %5366 = vmatprep.subr.bf16.mxu1 %v5365_v5 }
  0x49   : > { %5368 = vmatpush3.bf16.msra.mxu1 %v5365_v5 }
  0x4a   : > { %5370 = vmatprep.subr.bf16.mxu1 %v5369_v43 }
  0x4d   : > { %5372 = vmatpush3.bf16.msra.mxu1 %v5369_v43 }
  0x4e   : > { %5374 = vmatprep.subr.bf16.mxu1 %v5373_v19 }
  0x51   : > { %5376 = vmatpush3.bf16.msra.mxu1 %v5373_v19 }
  0x52   : > { %5378 = vmatprep.subr.bf16.mxu1 %v5377_v8 }
  0x55   : > { %5380 = vmatpush3.bf16.msra.mxu1 %v5377_v8 }
  0x56   : > { %5382 = vmatprep.subr.bf16.mxu1 %v5381_v44 }
  0x59   : > { %5384 = vmatpush3.bf16.msra.mxu1 %v5381_v44 }
  0x5a   : > { %5386 = vmatprep.subr.bf16.mxu1 %v6294_v12 }
  0xfe   : > { %v1279_v14 = vpop.f32.mrb[0].mxu0 }
  0xff   : > { %v1280_v15 = vadd.f32 %v6300_v13, %v1279_v14  ;;  %v1281_v16 = vpop.f32.mrb[1].mxu0 }
 0x101   : > { %v1313_v22 = vmax.f32 %v1280_v15, 0.0 }
 0x102   : > { %v1284_v26 = vpop.f32.mrb[2].mxu0 }
 0x103   : > { %v1327_v28 = vcombine.high %v1313_v22, %v1313_v22  ;;  %v1334_v29 = vrot.slane %v1313_v22, %v6058_v27  ;;  %v1285_v34 = vadd.f32 %v6300_v13, %v1284_v26  ;;  %v1286_v35 = vpop.f32.mrb[3].mxu0 }
 0x105   : > { %v1341_v21 = vrot.slane %v1327_v28, %v6058_v27  ;;  %v1342_v23 = vcombine.high %v1334_v29, %v1334_v29  ;;  %v1314_v37 = vmax.f32 %v1285_v34, 0.0  ;;  %v1350_v40 = vrot.slane %v1334_v29, %v6058_v27 }
 0x106   : > { %v1289_v41 = vpop.f32.mrb[4].mxu0 }
 0x107   : > { %v1343_v42 = vcombine.high %v1341_v21, %v1341_v21  ;;  %v1357_v45 = vrot.slane %v1341_v21, %v6058_v27  ;;  %v1364_v46 = vrot.slane %v1342_v23, %v6058_v27  ;;  %v1376_v47 = vcombine.high %v1314_v37, %v1314_v37  ;;  %v1291_v51 = vpop.f32.mrb[5].mxu0 }
 0x108   : > { %v1383_v52 = vrot.slane %v1314_v37, %v6058_v27  ;;  %v1290_v53 = vadd.f32 %v6300_v13, %v1289_v41 }
 0x109   : > { %v1371_v55 = vrot.slane %v1343_v42, %v6058_v27  ;;  %v1373_v32 = vcombine.high %v1357_v45, %v1357_v45  ;;  %v1643_v56 = vcombine.low %v1350_v40, %v1364_v46  ;;  %v4632_v57 = vcombine.high %v1350_v40, %v1364_v46 }
 0x10a   : > { %v1665_v24 = vrot.slane %v1357_v45, %v6058_v27  ;;  %v1390_v25 = vrot.slane %v1376_v47, %v6058_v27  ;;  %v1391_v38 = vcombine.high %v1383_v52, %v1383_v52  ;;  %v1399_v58 = vrot.slane %v1383_v52, %v6058_v27  ;;  %v1294_v59 = vpop.f32.mrb[6].mxu0 }
 0x10b   : > { %v1651_v60 = vrot.slane %v1643_v56, %v6058_v27  ;;  %v1658_v61 = vrot.slane %v4632_v57, %v6058_v27  ;;  %v1682_v62 = vcombine.low %v1371_v55, %v1373_v32  ;;  %v1375_v63 = vcombine.high %v1371_v55, %v1371_v55  ;;  %v1296_v0 = vpop.f32.mrb[7].mxu0 }
 0x10c   : > { %v1680_v30 = vrot.slane %v1665_v24, %v6058_v27  ;;  %v1392_v31 = vcombine.high %v1390_v25, %v1390_v25  ;;  %v1406_v48 = vrot.slane %v1390_v25, %v6058_v27  ;;  %v1413_v1 = vrot.slane %v1391_v38, %v6058_v27 }
 0x10d   : > { %v1666_v2 = vcombine.low %v1651_v60, %v1658_v61  ;;  %v1683_v3 = vcombine.low %v1375_v63, %v1399_v58  ;;  %v1690_v5 = vrot.slane %v1682_v62, %v6058_v27  ;;  %v1315_v6 = vmax.f32 %v1290_v53, 0.0 }
 0x10e   : > { %v1420_v7 = vrot.slane %v1392_v31, %v6058_v27  ;;  %v1422_v43 = vcombine.high %v1406_v48, %v1406_v48  ;;  %v1704_v49 = vrot.slane %v1413_v1, %v6058_v27  ;;  %v4633_v17 = vcombine.high %v1399_v58, %v1413_v1 }
 0x10f   : > { %v1299_v19 = vpop.f32.mrb[8].mxu0  ;;  %v1673_v20 = vrot.slane %v1666_v2, %v6058_v27  ;;  %v1697_v36 = vrot.slane %v1683_v3, %v6058_v27  ;;  %v1425_v8 = vcombine.high %v1315_v6, %v1315_v6  ;;  %v1432_v9 = vrot.slane %v1315_v6, %v6058_v27 }
 0x110   : > { %v1301_v10 = vpop.f32.mrb[9].mxu0  ;;  %v1719_v44 = vrot.slane %v1704_v49, %v6058_v27  ;;  %v1722_v50 = vcombine.low %v1406_v48, %v1420_v7  ;;  %v1729_v18 = vrot.slane %v4633_v17, %v6058_v27  ;;  %v1743_v14 = vrot.slane %v1422_v43, %v6058_v27 }
 0x111   : > { %v1681_v15 = vcombine.low %v1673_v20, %v1680_v30  ;;  %v1705_v16 = vcombine.low %v1690_v5, %v1697_v36  ;;  %v1424_v22 = vcombine.high %v1420_v7, %v1420_v7  ;;  %v1439_v26 = vrot.slane %v1425_v8, %v6058_v27 }
 0x112   : > { %v1736_v28 = vrot.slane %v1722_v50, %v6058_v27  ;;  %v1758_v29 = vrot.slane %v1743_v14, %v6058_v27  ;;  %v1440_v34 = vcombine.high %v1432_v9, %v1432_v9  ;;  %v1448_v35 = vrot.slane %v1432_v9, %v6058_v27 }
 0x113   : > { %2043 = vst [vmem:[#allocation2] sm:$0x1f] %v1681_v15  ;;  %v1712_v23 = vrot.slane %v1705_v16, %v6058_v27  ;;  %v1441_v37 = vcombine.high %v1439_v26, %v1439_v26  ;;  %v1455_v39 = vrot.slane %v1439_v26, %v6058_v27  ;;  %v1295_v33 = vadd.f32 %v6300_v13, %v1294_v59 }
 0x114   : > { %v1744_v41 = vcombine.low %v1729_v18, %v1736_v28  ;;  %v1462_v42 = vrot.slane %v1440_v34, %v6058_v27  ;;  %v1470_v45 = vcombine.high %v1448_v35, %v1448_v35  ;;  %v1760_v46 = vcombine.low %v1424_v22, %v1448_v35 }
 0x115   : > { %v6341_v21 = vpop.f32.mrb[10].mxu0  ;;  %v1720_v47 = vcombine.low %v1712_v23, %v1719_v44  ;;  %v1469_v51 = vrot.slane %v1441_v37, %v6058_v27  ;;  %v1316_v52 = vmax.f32 %v1295_v33, 0.0  ;;  %v1300_v53 = vadd.f32 %v6300_v13, %v1299_v19 }
 0x116   : > { %v1306_v40 = vpop.f32.mrb[11].mxu0  ;;  %v1751_v55 = vrot.slane %v1744_v41, %v6058_v27  ;;  %v1472_v32 = vcombine.high %v1462_v42, %v1462_v42  ;;  %v1761_v56 = vcombine.low %v1462_v42, %v1470_v45  ;;  %v1768_v57 = vrot.slane %v1760_v46, %v6058_v27 }
 0x117   : > { %2044 = vst [vmem:[#allocation2 + $0x8] sm:$0x1f] %v1720_v47  ;;  %v1799_v25 = vcombine.low %v1455_v39, %v1469_v51  ;;  %v4634_v38 = vcombine.high %v1455_v39, %v1469_v51  ;;  %v1474_v58 = vcombine.high %v1316_v52, %v1316_v52  ;;  %v1481_v59 = vrot.slane %v1316_v52, %v6058_v27 }
 0x118   : > { %v1759_v61 = vcombine.low %v1751_v55, %v1758_v29  ;;  %v1775_v62 = vrot.slane %v1761_v56, %v6058_v27  ;;  %v1782_v63 = vrot.slane %v1472_v32, %v6058_v27  ;;  %v1317_v0 = vmax.f32 %v1300_v53, 0.0 }
 0x119   : > { %v1309_v24 = vpop.f32.mrb[12].mxu0  ;;  %v1807_v30 = vrot.slane %v1799_v25, %v6058_v27  ;;  %v1814_v31 = vrot.slane %v4634_v38, %v6058_v27  ;;  %v1488_v48 = vrot.slane %v1474_v58, %v6058_v27  ;;  %v1489_v1 = vcombine.high %v1481_v59, %v1481_v59 }
 0x11a   : > { %v1311_v60 = vpop.f32.mrb[13].mxu0  ;;  %2045 = vst [vmem:[#allocation2 + $0x10] sm:$0x1f] %v1759_v61  ;;  %v1783_v2 = vcombine.low %v1768_v57, %v1775_v62  ;;  %v1797_v3 = vrot.slane %v1782_v63, %v6058_v27  ;;  %v1497_v5 = vrot.slane %v1481_v59, %v6058_v27  ;;  %v1523_v6 = vcombine.high %v1317_v0, %v1317_v0  ;;  %v4687_v62 = vld [vmem:[%s7456_s5 + $0x48] sm:$0xff] }
 0x11b   : > { %v1822_v7 = vcombine.low %v1807_v30, %v1814_v31  ;;  %v1490_v43 = vcombine.high %v1488_v48, %v1488_v48  ;;  %v1504_v49 = vrot.slane %v1488_v48, %v6058_v27  ;;  %v1511_v17 = vrot.slane %v1489_v1, %v6058_v27  ;;  %v2065_v30 = vld [vmem:[%s7454_s3 + $0x20] sm:$0xff]  ;;  %v2066_v31 = vld [vmem:[%s7454_s3 + $0x28] sm:$0xff] }
 0x11c   : > { %v1790_v19 = vrot.slane %v1783_v2, %v6058_v27  ;;  %v1519_v20 = vcombine.high %v1497_v5, %v1497_v5  ;;  %v1821_v36 = vrot.slane %v1497_v5, %v6058_v27  ;;  %v1530_v8 = vrot.slane %v1317_v0, %v6058_v27 }
 0x11d   : > { %v1518_v9 = vrot.slane %v1490_v43, %v6058_v27  ;;  %v1521_v10 = vcombine.high %v1511_v17, %v1511_v17  ;;  %v1829_v44 = vrot.slane %v1822_v7, %v6058_v27  ;;  %v1537_v50 = vrot.slane %v1523_v6, %v6058_v27 }
 0x11e   : > { %v1798_v18 = vcombine.low %v1790_v19, %v1797_v3  ;;  %v1836_v14 = vrot.slane %v1821_v36, %v6058_v27  ;;  %v1838_v15 = vcombine.low %v1511_v17, %v1519_v20  ;;  %v1538_v16 = vcombine.high %v1530_v8, %v1530_v8  ;;  %v5838_v22 = vld [vmem:[#allocation2 + $0x1] ss:$8 sps:$4 sm:$0xff]  }
 0x11f   : > { %v1839_v26 = vcombine.low %v1521_v10, %v1504_v49  ;;  %v1860_v28 = vrot.slane %v1518_v9, %v6058_v27  ;;  %v4635_v29 = vcombine.high %v1504_v49, %v1518_v9  ;;  %v1539_v34 = vcombine.high %v1537_v50, %v1537_v50  ;;  %5035 = vmatprep.mubr.f32.mxu1 %v5838_v22 }
 0x120   : > { %2046 = vst [vmem:[#allocation2 + $0x18] sm:$0x1f] %v1798_v18  ;;  %v1837_v35 = vcombine.low %v1829_v44, %v1836_v14  ;;  %v1846_v23 = vrot.slane %v1838_v15, %v6058_v27  ;;  %v1546_v37 = vrot.slane %v1530_v8, %v6058_v27  ;;  %v1553_v39 = vrot.slane %v1537_v50, %v6058_v27 }
 0x121   : > { %v1853_v33 = vrot.slane %v1839_v26, %v6058_v27  ;;  %v1875_v40 = vrot.slane %v1860_v28, %v6058_v27  ;;  %v1885_v41 = vrot.slane %v4635_v29, %v6058_v27  ;;  %v1560_v42 = vrot.slane %v1538_v16, %v6058_v27  ;;  %v2068_v28 = vld [vmem:[%s7454_s3 + $0x38] sm:$0xff] }
 0x122   : > { %2047 = vst [vmem:[#allocation2 + $0x20] sm:$0x1f] %v1837_v35  ;;  %v1567_v45 = vrot.slane %v1539_v34, %v6058_v27  ;;  %v1568_v46 = vcombine.high %v1546_v37, %v1546_v37  ;;  %v1569_v47 = vcombine.high %v1553_v39, %v1553_v39  ;;  %v1305_v51 = vadd.f32 %v6300_v13, %v6341_v21  ;;  %v4686_v21 = vld [vmem:[%s7456_s5 + $0x40] sm:$0xff] }
 0x123   : > { %v1861_v52 = vcombine.low %v1846_v23, %v1853_v33  ;;  %v1570_v53 = vcombine.high %v1560_v42, %v1560_v42  ;;  %v1878_v55 = vcombine.low %v1546_v37, %v1560_v42  ;;  %v1310_v32 = vadd.f32 %v6300_v13, %v1309_v24  ;;  %v2069_v42 = vld [vmem:[%s7454_s3 + $0x40] sm:$0xff] }
 0x124   : > { %v1571_v56 = vcombine.high %v1567_v45, %v1567_v45  ;;  %v1899_v57 = vrot.slane %v1568_v46, %v6058_v27  ;;  %v1917_v25 = vcombine.low %v1567_v45, %v1569_v47  ;;  %v1318_v38 = vmax.f32 %v1305_v51, 0.0 }
 0x125   : > { %v1868_v58 = vrot.slane %v1861_v52, %v6058_v27  ;;  %v1892_v59 = vrot.slane %v1878_v55, %v6058_v27  ;;  %v1916_v60 = vcombine.low %v1570_v53, %v1553_v39  ;;  %v1319_v61 = vmax.f32 %v1310_v32, 0.0 }
 0x126   : > { %v1914_v13 = vrot.slane %v1899_v57, %v6058_v27  ;;  %v1931_v24 = vrot.slane %v1917_v25, %v6058_v27  ;;  %v1938_v63 = vrot.slane %v1571_v56, %v6058_v27  ;;  %v1572_v0 = vcombine.high %v1318_v38, %v1318_v38  ;;  %v2071_v56 = vld [vmem:[%s7454_s3 + $0x50] sm:$0xff]  ;;  %v2072_v57 = vld [vmem:[%s7454_s3 + $0x58] sm:$0xff] }
 0x127   : > { %v1876_v48 = vcombine.low %v1868_v58, %v1875_v40  ;;  %v1900_v1 = vcombine.low %v1885_v41, %v1892_v59  ;;  %v1924_v2 = vrot.slane %v1916_v60, %v6058_v27  ;;  %v1579_v3 = vrot.slane %v1318_v38, %v6058_v27  ;;  %v5839_v5 = vld [vmem:[#allocation2 + $0x11] ss:$8 sps:$4 sm:$0xff]  }
 0x128   : > { %v1953_v6 = vrot.slane %v1938_v63, %v6058_v27  ;;  %v1586_v7 = vrot.slane %v1572_v0, %v6058_v27  ;;  %v1627_v43 = vrot.slane %v1319_v61, %v6058_v27  ;;  %v5482_v49 = vpack.c.bf16 %v4687_v62, %v4686_v21  ;;  %5036 = vmatmul.mubr.f32.vlgmr.msra.gmra.mrb[0].mxu1 %v5839_v5  ;;  %v2073_v62 = vld [vmem:[%s7454_s3 + $0x60] sm:$0xff]  ;;  %v2076_v63 = vld [vmem:[%s7454_s3 + $0x78] sm:$0xff] }
 0x129   : > { %2048 = vst [vmem:[#allocation2 + $0x28] sm:$0x1f] %v1876_v48  ;;  %v1907_v17 = vrot.slane %v1900_v1, %v6058_v27  ;;  %v1939_v19 = vcombine.low %v1924_v2, %v1931_v24  ;;  %v1587_v20 = vcombine.high %v1579_v3, %v1579_v3  ;;  %v1595_v36 = vrot.slane %v1579_v3, %v6058_v27  ;;  %v4653_v48 = vld [vmem:[%s7454_s3 + $0x100] sm:$0xff]  ;;  %v4654_v1 = vld [vmem:[%s7454_s3 + $0x108] sm:$0xff]  ;;  %v4655_v3 = vld [vmem:[%s7454_s3 + $0x110] sm:$0xff] }
 0x12a   : > { %v1588_v8 = vcombine.high %v1586_v7, %v1586_v7  ;;  %v1602_v9 = vrot.slane %v1586_v7, %v6058_v27  ;;  %v1628_v10 = vcombine.high %v1627_v43, %v1627_v43  ;;  %5388 = vmatpush3.bf16.msra.mxu1 %v6294_v12  ;;  %v5393_v44 = vpack.c.bf16 %v2066_v31, %v2065_v30  ;;  %v2067_v12 = vld [vmem:[%s7454_s3 + $0x30] sm:$0xff]  ;;  %v5842_v30 = vld [vmem:[#allocation2] ss:$8 sps:$4 sm:$0xff]   ;;  %v4656_v5 = vld [vmem:[%s7454_s3 + $0x118] sm:$0xff] }
 0x12b   : > { %v1915_v50 = vcombine.low %v1907_v17, %v1914_v13  ;;  %v1946_v18 = vrot.slane %v1939_v19, %v6058_v27  ;;  %v1609_v14 = vrot.slane %v1587_v20, %v6058_v27  ;;  %5390 = vmatprep.subr.bf16.mxu1 %v6317_v54  ;;  %5483 = vmatpush3.bf16.msra.mxu0 %v5482_v49  ;;  %v2074_v13 = vld [vmem:[%s7454_s3 + $0x68] sm:$0xff]  ;;  %v4657_v49 = vld [vmem:[%s7454_s3 + $0x120] sm:$0xff] }
 0x12c   : > { %v1616_v15 = vrot.slane %v1588_v8, %v6058_v27  ;;  %v1618_v16 = vcombine.high %v1602_v9, %v1602_v9  ;;  %v1635_v22 = vrot.slane %v1627_v43, %v6058_v27  ;;  %v1642_v26 = vrot.slane %v1628_v10, %v6058_v27  ;;  %5484 = vmatprep.subr.bf16.mxu0 %v5898_v4  ;;  %v4658_v17 = vld [vmem:[%s7454_s3 + $0x128] sm:$0xff]  ;;  %v4659_v8 = vld [vmem:[%s7454_s3 + $0x130] sm:$0xff] }
 0x12d   : > { %v1954_v29 = vcombine.low %v1946_v18, %v1953_v6  ;;  %2049 = vst [vmem:[#allocation2 + $0x30] sm:$0x1f] %v1915_v50  ;;  %v1955_v34 = vcombine.low %v1595_v36, %v1609_v14  ;;  %v4636_v35 = vcombine.high %v1595_v36, %v1609_v14  ;;  %v1977_v23 = vrot.slane %v1602_v9, %v6058_v27  ;;  %v5843_v6 = vld [vmem:[#allocation2 + $0x10] ss:$8 sps:$4 sm:$0xff]   ;;  %v4662_v50 = vld [vmem:[%s7454_s3 + $0x148] sm:$0xff] }
 0x12e   : > { %v1994_v37 = vcombine.low %v1616_v15, %v1618_v16  ;;  %v1620_v39 = vcombine.high %v1616_v15, %v1616_v15  ;;  %5392 = vmatpush3.bf16.msra.mxu1 %v6317_v54  ;;  %v5397_v41 = vpack.c.bf16 %v2068_v28, %v2067_v12  ;;  %v2016_v47 = vrot.slane %v1642_v26, %v6058_v27  ;;  %v2070_v54 = vld [vmem:[%s7454_s3 + $0x48] sm:$0xff]  ;;  %v4660_v9 = vld [vmem:[%s7454_s3 + $0x138] sm:$0xff]  ;;  %v4663_v14 = vld [vmem:[%s7454_s3 + $0x150] sm:$0xff] }
 0x12f   : > { %2050 = vst [vmem:[#allocation2 + $0x38] sm:$0x1f] %v1954_v29  ;;  %v1963_v33 = vrot.slane %v1955_v34, %v6058_v27  ;;  %v1970_v40 = vrot.slane %v4636_v35, %v6058_v27  ;;  %5394 = vmatprep.subr.bf16.mxu1 %v5393_v44  ;;  %v1992_v52 = vrot.slane %v1977_v23, %v6058_v27  ;;  %v5846_v36 = vld [vmem:[#allocation2 + $0x8] ss:$8 sps:$4 sm:$0xff]   ;;  %v4664_v15 = vld [vmem:[%s7454_s3 + $0x158] sm:$0xff]  ;;  %v4669_v35 = vld [vmem:[%s7454_s3 + $0x180] sm:$0xff] }
 0x130   : > { %v1995_v45 = vcombine.low %v1620_v39, %v1635_v22  ;;  %v2002_v46 = vrot.slane %v1994_v37, %v6058_v27  ;;  %v5401_v32 = vpack.c.bf16 %v2070_v54, %v2069_v42  ;;  %v2031_v38 = vrot.slane %v2016_v47, %v6058_v27  ;;  %v4665_v22 = vld [vmem:[%s7454_s3 + $0x160] sm:$0xff]  ;;  %v4666_v26 = vld [vmem:[%s7454_s3 + $0x168] sm:$0xff]  ;;  %v4667_v28 = vld [vmem:[%s7454_s3 + $0x170] sm:$0xff] }
 0x131   : > { %v1978_v51 = vcombine.low %v1963_v33, %v1970_v40  ;;  %v5405_v61 = vpack.c.bf16 %v2072_v57, %v2071_v56  ;;  %v5409_v24 = vpack.c.bf16 %v2074_v13, %v2073_v62  ;;  %v5417_v2 = vpack.c.bf16 %v4654_v1, %v4653_v48  ;;  %v4668_v29 = vld [vmem:[%s7454_s3 + $0x178] sm:$0xff]  ;;  %v4670_v23 = vld [vmem:[%s7454_s3 + $0x188] sm:$0xff]  ;;  %v4671_v39 = vld [vmem:[%s7454_s3 + $0x190] sm:$0xff] }
 0x132   : > { %v2009_v53 = vrot.slane %v1995_v45, %v6058_v27  ;;  %5396 = vmatpush3.bf16.msra.mxu1 %v5393_v44  ;;  %v5421_v7 = vpack.c.bf16 %v4656_v5, %v4655_v3  ;;  %v5425_v20 = vpack.c.bf16 %v4658_v17, %v4657_v49  ;;  %v5429_v10 = vpack.c.bf16 %v4660_v9, %v4659_v8  ;;  %v4661_v44 = vld [vmem:[%s7454_s3 + $0x140] sm:$0xff]  ;;  %v4672_v33 = vld [vmem:[%s7454_s3 + $0x198] sm:$0xff]  ;;  %v4678_v56 = vld [vmem:[%s7454_s3 + $0x1c8] sm:$0xff] }
 0x133   : > { %v1985_v55 = vrot.slane %v1978_v51, %v6058_v27  ;;  %5398 = vmatprep.subr.bf16.mxu1 %v5397_v41  ;;  %v5433_v18 = vpack.c.bf16 %v4662_v50, %v4661_v44  ;;  %v5437_v16 = vpack.c.bf16 %v4664_v15, %v4663_v14  ;;  %v5441_v12 = vpack.c.bf16 %v4666_v26, %v4665_v22  ;;  %v5847_v40 = vld [vmem:[#allocation2 + $0x18] ss:$8 sps:$4 sm:$0xff]   ;;  %v5850_v51 = vld [vmem:[#allocation2 + $0x9] ss:$8 sps:$4 sm:$0xff]  }
 0x134   : > { %v2017_v25 = vcombine.low %v2002_v46, %v2009_v53  ;;  %v5840_v58 = vld [vmem:[#allocation2 + $0x29] ss:$8 sps:$4 sm:$0xff]   ;;  %v5445_v34 = vpack.c.bf16 %v4668_v29, %v4667_v28  ;;  %v5449_v37 = vpack.c.bf16 %v4670_v23, %v4669_v35  ;;  %v4673_v45 = vld [vmem:[%s7454_s3 + $0x1a0] sm:$0xff]  ;;  %v4676_v53 = vld [vmem:[%s7454_s3 + $0x1b8] sm:$0xff]  ;;  %v5901_v5 = vmov 0.0  }
 0x135   : > { %v1993_v59 = vcombine.low %v1985_v55, %v1992_v52  ;;  %5038 = vmatprep.mubr.f32.mxu1 %v5840_v58  ;;  %v5844_v43 = vld [vmem:[#allocation2 + $0x28] ss:$8 sps:$4 sm:$0xff]   ;;  %v4684_v62 = vld [vmem:[%s7454_s3 + $0x1f8] sm:$0xff]  ;;  %5171 = vmatprep.mubr.msk.f32.mxu0 %vm5900_vm1, %v5901_v5  ;;  %v4685_v14 = vld [vmem:[%s7455_s4] ss:$0 sm:$0xff] }
 0x136   : > { %v2024_v60 = vrot.slane %v2017_v25, %v6058_v27  ;;  %5400 = vmatpush3.bf16.msra.mxu1 %v5397_v41  ;;  %v2075_v27 = vld [vmem:[%s7454_s3 + $0x70] sm:$0xff]  ;;  %v5453_v41 = vpack.c.bf16 %v4672_v33, %v4671_v39  ;;  %v4674_v46 = vld [vmem:[%s7454_s3 + $0x1a8] sm:$0xff]  ;;  %v4739_v50 = vld [vmem:[%s7456_s5 + $0x1b8] sm:$0xff] }
 0x137   : > { %2051 = vst [vmem:[#allocation2 + $0x40] sm:$0x1f] %v1993_v59  ;;  %5402 = vmatprep.subr.bf16.mxu1 %v5401_v32  ;;  %v5413_v31 = vpack.c.bf16 %v2076_v63, %v2075_v27  ;;  %v5848_v42 = vld [vmem:[#allocation2 + $0x30] ss:$8 sps:$4 sm:$0xff]   ;;  %v5457_v54 = vpack.c.bf16 %v4674_v46, %v4673_v45  ;;  %v4681_v59 = vld [vmem:[%s7454_s3 + $0x1e0] sm:$0xff]  ;;  %v4733_v1 = vld [vmem:[%s7456_s5 + $0x188] sm:$0xff] }
 0x138   : > { %v2032_v21 = vcombine.low %v2024_v60, %v2031_v38  ;;  %v4675_v52 = vld [vmem:[%s7454_s3 + $0x1b0] sm:$0xff]  ;;  %v4680_v38 = vld [vmem:[%s7454_s3 + $0x1d8] sm:$0xff]  ;;  %v4682_v60 = vld [vmem:[%s7454_s3 + $0x1e8] sm:$0xff] }
 0x139   : > { %v5461_v55 = vpack.c.bf16 %v4676_v53, %v4675_v52  ;;  %v4679_v25 = vld [vmem:[%s7454_s3 + $0x1d0] sm:$0xff]  ;;  %v4691_v3 = vld [vmem:[%s7456_s5 + $0x68] sm:$0xff]  ;;  %v4750_v46 = vld [vmem:[%s7456_s5 + $0x200] sm:$0xff] }
 0x13a   : > { %2052 = vst [vmem:[#allocation2 + $0x48] sm:$0x1f] %v2032_v21  ;;  %5404 = vmatpush3.bf16.msra.mxu1 %v5401_v32  ;;  %v4677_v32 = vld [vmem:[%s7454_s3 + $0x1c0] sm:$0xff]  ;;  %v5469_v58 = vpack.c.bf16 %v4680_v38, %v4679_v25  ;;  %v4683_v21 = vld [vmem:[%s7454_s3 + $0x1f0] sm:$0xff]  ;;  %v4737_v8 = vld [vmem:[%s7456_s5 + $0x1a8] sm:$0xff] }
 0x13b   : > { %5406 = vmatprep.subr.bf16.mxu1 %v5405_v61  ;;  %v5465_v57 = vpack.c.bf16 %v4678_v56, %v4677_v32  ;;  %v5477_v13 = vpack.c.bf16 %v4684_v62, %v4683_v21  ;;  %v5852_v27 = vld [vmem:[#allocation2 + $0x31] ss:$8 sps:$4 sm:$0xff]   ;;  %v4754_v21 = vld [vmem:[%s7456_s5 + $0x220] sm:$0xff]  ;;  %v4755_v62 = vld [vmem:[%s7456_s5 + $0x228] sm:$0xff] }
 0x13c   : > { %v4738_v44 = vld [vmem:[%s7456_s5 + $0x1b0] sm:$0xff]  ;;  %v4753_v38 = vld [vmem:[%s7456_s5 + $0x218] sm:$0xff] }
 0x13d   : > { %v4752_v56 = vld [vmem:[%s7456_s5 + $0x210] sm:$0xff] }
 0x13e   : > { %v5841_v0 = vld [vmem:[#allocation2 + $0x39] ss:$8 sps:$4 sm:$0xff]   ;;  %5408 = vmatpush3.bf16.msra.mxu1 %v5405_v61  ;;  %v5473_v61 = vpack.c.bf16 %v4682_v60, %v4681_v59  ;;  %v2607_v59 = vld [vmem:[%s7456_s5 + $0x10] sm:$0xff] }
 0x13f   : > { %5410 = vmatprep.subr.bf16.mxu1 %v5409_v24  ;;  %5039 = vmatmul.mubr.f32.gmra.mrb[2].mxu1 %v5841_v0  ;;  %v5845_v19 = vld [vmem:[#allocation2 + $0x38] ss:$8 sps:$4 sm:$0xff]   ;;  %v4688_v0 = vld [vmem:[%s7456_s5 + $0x50] sm:$0xff] }
 0x140   : > { %5073 = vmatprep.mubr.f32.mxu1 %v5842_v30  ;;  %v4689_v30 = vld [vmem:[%s7456_s5 + $0x58] sm:$0xff] }
 0x141   : > { %v5849_v47 = vld [vmem:[#allocation2 + $0x40] ss:$8 sps:$4 sm:$0xff]   ;;  %v5485_v48 = vpack.c.bf16 %v4689_v30, %v4688_v0  ;;  %v2608_v60 = vld [vmem:[%s7456_s5 + $0x18] sm:$0xff]  ;;  %v4756_v30 = vld [vmem:[%s7456_s5 + $0x230] sm:$0xff] }
 0x142   : > { %5412 = vmatpush3.bf16.msra.mxu1 %v5409_v24  ;;  %v5851_v24 = vld [vmem:[#allocation2 + $0x19] ss:$8 sps:$4 sm:$0xff]  }
 0x143   : > { %5414 = vmatprep.subr.bf16.mxu1 %v5413_v31  ;;  %v5853_v63 = vld [vmem:[#allocation2 + $0x41] ss:$8 sps:$4 sm:$0xff]   ;;  %5486 = vmatpush3.bf16.msra.mxu0 %v5485_v48 }
 0x144   : > { %5487 = vmatprep.subr.bf16.mxu0 %v5898_v4 }
 0x146   : > { %5416 = vmatpush3.bf16.msra.mxu1 %v5413_v31  ;;  %v4732_v31 = vld [vmem:[%s7456_s5 + $0x180] sm:$0xff] }
 0x147   : > { %5418 = vmatprep.subr.bf16.mxu1 %v5417_v2 }
 0x149   : > { %5074 = vmatmul.mubr.f32.vlgmr.msra.gmra.mrb[0].mxu1 %v5843_v6  ;;  %v5554_v6 = vpack.c.bf16 %v4733_v1, %v4732_v31  ;;  %v4757_v31 = vld [vmem:[%s7456_s5 + $0x238] sm:$0xff]  ;;  %v2611_v1 = vld [vmem:[%s7456_s5 + $0x30] sm:$0xff] }
 0x14a   : > { %5076 = vmatprep.mubr.f32.mxu1 %v5844_v43  ;;  %5420 = vmatpush3.bf16.msra.mxu1 %v5417_v2  ;;  %v4690_v2 = vld [vmem:[%s7456_s5 + $0x60] sm:$0xff]  ;;  %v4735_v43 = vld [vmem:[%s7456_s5 + $0x198] sm:$0xff] }
 0x14b   : > { %5422 = vmatprep.subr.bf16.mxu1 %v5421_v7  ;;  %v5488_v49 = vpack.c.bf16 %v4691_v3, %v4690_v2  ;;  %v2612_v2 = vld [vmem:[%s7456_s5 + $0x38] sm:$0xff] }
 0x14d   : > { %5077 = vmatmul.mubr.f32.gmra.mrb[2].mxu1 %v5845_v19  ;;  %v4692_v19 = vld [vmem:[%s7456_s5 + $0x70] sm:$0xff]  ;;  %5489 = vmatpush3.bf16.msra.mxu0 %v5488_v49  ;;  %v5503_v49 = vpack.c.bf16 %v2612_v2, %v2611_v1  ;;  %v4728_v1 = vld [vmem:[%s7456_s5 + $0x168] sm:$0xff] }
 0x14e   : > { %5424 = vmatpush3.bf16.msra.mxu1 %v5421_v7  ;;  %5111 = vmatprep.mubr.f32.mxu1 %v5846_v36  ;;  %v4734_v7 = vld [vmem:[%s7456_s5 + $0x190] sm:$0xff]  ;;  %v4736_v36 = vld [vmem:[%s7456_s5 + $0x1a0] sm:$0xff] }
 0x14f   : > { %5426 = vmatprep.subr.bf16.mxu1 %v5425_v20  ;;  %v5557_v17 = vpack.c.bf16 %v4735_v43, %v4734_v7  ;;  %5490 = vmatprep.subr.bf16.mxu0 %v5898_v4  ;;  %v5587_v7 = vpack.c.bf16 %v4757_v31, %v4756_v30  ;;  %v4726_v30 = vld [vmem:[%s7456_s5 + $0x158] sm:$0xff] }
 0x152   : > { %5428 = vmatpush3.bf16.msra.mxu1 %v5425_v20  ;;  %v4693_v20 = vld [vmem:[%s7456_s5 + $0x78] sm:$0xff] }
 0x153   : > { %5430 = vmatprep.subr.bf16.mxu1 %v5429_v10  ;;  %v5491_v9 = vpack.c.bf16 %v4693_v20, %v4692_v19  ;;  %v4697_v19 = vld [vmem:[%s7456_s5 + $0x88] sm:$0xff] }
 0x155   : > { %5492 = vmatpush3.bf16.msra.mxu0 %v5491_v9  ;;  %v4698_v9 = vld [vmem:[%s7456_s5 + $0x90] sm:$0xff] }
 0x156   : > { %5432 = vmatpush3.bf16.msra.mxu1 %v5429_v10  ;;  %v5560_v10 = vpack.c.bf16 %v4737_v8, %v4736_v36  ;;  %5493 = vmatprep.subr.bf16.mxu0 %v5898_v4 }
 0x157   : > { %5434 = vmatprep.subr.bf16.mxu1 %v5433_v18 }
 0x15a   : > { %5436 = vmatpush3.bf16.msra.mxu1 %v5433_v18  ;;  %v5563_v18 = vpack.c.bf16 %v4739_v50, %v4738_v44  ;;  %v4700_v50 = vld [vmem:[%s7456_s5 + $0xa0] sm:$0xff] }
 0x15b   : > { %5438 = vmatprep.subr.bf16.mxu1 %v5437_v16 }
 0x15e   : > { %5440 = vmatpush3.bf16.msra.mxu1 %v5437_v16 }
 0x15f   : > { %5442 = vmatprep.subr.bf16.mxu1 %v5441_v12 }
 0x162   : > { %5444 = vmatpush3.bf16.msra.mxu1 %v5441_v12 }
 0x163   : > { %5446 = vmatprep.subr.bf16.mxu1 %v5445_v34 }
 0x166   : > { %5448 = vmatpush3.bf16.msra.mxu1 %v5445_v34 }
 0x167   : > { %5450 = vmatprep.subr.bf16.mxu1 %v5449_v37 }
 0x169   : > { %5112 = vmatmul.mubr.f32.vlgmr.msra.gmra.mrb[0].mxu1 %v5847_v40 }
 0x16a   : > { %5114 = vmatprep.mubr.f32.mxu1 %v5848_v42  ;;  %5452 = vmatpush3.bf16.msra.mxu1 %v5449_v37 }
 0x16b   : > { %5454 = vmatprep.subr.bf16.mxu1 %v5453_v41 }
 0x16d   : > { %5115 = vmatmul.mubr.f32.gmra.mrb[2].mxu1 %v5849_v47  ;;  %v4751_v47 = vld [vmem:[%s7456_s5 + $0x208] sm:$0xff] }
 0x16e   : > { %5456 = vmatpush3.bf16.msra.mxu1 %v5453_v41  ;;  %5149 = vmatprep.mubr.f32.mxu1 %v5850_v51  ;;  %v2605_v51 = vld [vmem:[%s7456_s5] sm:$0xff]  ;;  %v5578_v32 = vpack.c.bf16 %v4751_v47, %v4750_v46 }
 0x16f   : > { %5458 = vmatprep.subr.bf16.mxu1 %v5457_v54 }
 0x172   : > { %5460 = vmatpush3.bf16.msra.mxu1 %v5457_v54 }
 0x173   : > { %5462 = vmatprep.subr.bf16.mxu1 %v5461_v55 }
 0x176   : > { %5464 = vmatpush3.bf16.msra.mxu1 %v5461_v55  ;;  %v2606_v55 = vld [vmem:[%s7456_s5 + $0x8] sm:$0xff] }
 0x177   : > { %5466 = vmatprep.subr.bf16.mxu1 %v5465_v57  ;;  %v5494_v25 = vpack.c.bf16 %v2606_v55, %v2605_v51  ;;  %v4714_v51 = vld [vmem:[%s7456_s5 + $0x100] sm:$0xff] }
 0x17a   : > { %5468 = vmatpush3.bf16.msra.mxu1 %v5465_v57 }
 0x17b   : > { %5470 = vmatprep.subr.bf16.mxu1 %v5469_v58 }
 0x17e   : > { %5472 = vmatpush3.bf16.msra.mxu1 %v5469_v58 }
 0x17f   : > { %5474 = vmatprep.subr.bf16.mxu1 %v5473_v61 }
 0x182   : > { %5476 = vmatpush3.bf16.msra.mxu1 %v5473_v61  ;;  %v5581_v61 = vpack.c.bf16 %v4753_v38, %v4752_v56  ;;  %v4717_v56 = vld [vmem:[%s7456_s5 + $0x118] sm:$0xff]  ;;  %v4719_v38 = vld [vmem:[%s7456_s5 + $0x128] sm:$0xff] }
 0x183   : > { %5478 = vmatprep.subr.bf16.mxu1 %v5477_v13 }
 0x186   : > { %5480 = vmatpush3.bf16.msra.mxu1 %v5477_v13  ;;  %v5497_v13 = vpack.c.bf16 %v2608_v60, %v2607_v59  ;;  %v4720_v59 = vld [vmem:[%s7456_s5 + $0x130] sm:$0xff]  ;;  %v4721_v60 = vld [vmem:[%s7456_s5 + $0x138] sm:$0xff] }
 0x187   : > { %5553 = vmatprep.subr.bf16.mxu1 %v5898_v4 }
 0x189   : > { %5150 = vmatmul.mubr.f32.vlgmr.msra.gmra.mrb[0].mxu1 %v5851_v24  ;;  %v2609_v24 = vld [vmem:[%s7456_s5 + $0x20] sm:$0xff] }
 0x18a   : > { %5152 = vmatprep.mubr.f32.mxu1 %v5852_v27  ;;  %5555 = vmatpush3.bf16.msra.mxu1 %v5554_v6  ;;  %v2610_v27 = vld [vmem:[%s7456_s5 + $0x28] sm:$0xff] }
 0x18b   : > { %5556 = vmatprep.subr.bf16.mxu1 %v5898_v4  ;;  %v5500_v0 = vpack.c.bf16 %v2610_v27, %v2609_v24  ;;  %v4724_v24 = vld [vmem:[%s7456_s5 + $0x148] sm:$0xff] }
 0x18d   : > { %5153 = vmatmul.mubr.f32.gmra.mrb[2].mxu1 %v5853_v63  ;;  %v5584_v63 = vpack.c.bf16 %v4755_v62, %v4754_v21  ;;  %v5539_v62 = vpack.c.bf16 %v4721_v60, %v4720_v59  ;;  %v3633_v60 = vld [vmem:[%s7458_s7 + $0x198] sm:$0xff] }
 0x18e   : > { %5285 = vmatprep.mubr.msk.f32.mxu1 %vm5900_vm1, %v5901_v5  ;;  %5558 = vmatpush3.bf16.msra.mxu1 %v5557_v17  ;;  %v4696_v17 = vld [vmem:[%s7456_s5 + $0x80] sm:$0xff] }
 0x18f   : > { %5559 = vmatprep.subr.bf16.mxu1 %v5898_v4  ;;  %v5506_v36 = vpack.c.bf16 %v4697_v19, %v4696_v17  ;;  %v4741_v17 = vld [vmem:[%s7456_s5 + $0x1c0] sm:$0xff]  ;;  %v4742_v19 = vld [vmem:[%s7456_s5 + $0x1c8] sm:$0xff] }
 0x192   : > { %5561 = vmatpush3.bf16.msra.mxu1 %v5560_v10  ;;  %v4699_v10 = vld [vmem:[%s7456_s5 + $0x98] sm:$0xff] }
 0x193   : > { %5562 = vmatprep.subr.bf16.mxu1 %v5898_v4  ;;  %v5509_v44 = vpack.c.bf16 %v4699_v10, %v4698_v9  ;;  %v4744_v9 = vld [vmem:[%s7456_s5 + $0x1d8] sm:$0xff] }
 0x196   : > { %5564 = vmatpush3.bf16.msra.mxu1 %v5563_v18  ;;  %v4701_v18 = vld [vmem:[%s7456_s5 + $0xa8] sm:$0xff] }
 0x197   : > { %5577 = vmatprep.subr.bf16.mxu1 %v5898_v4 }
 0x25c   : > { %v5151_v15 = vpop.f32.mrb[0].mxu1 }
 0x25d   : > { %v2573_v16 = vadd.f32 %v5151_v15, %v4685_v14  ;;  %v2542_v22 = vpop.f32.mrb[1].mxu1  ;;  %v4702_v15 = vld [vmem:[%s7456_s5 + $0xb0] sm:$0xff] }
 0x25e   : > { %v2572_v26 = vadd.f32 %v4685_v14, %v2542_v22 }
 0x25f   : > { %v2577_v12 = vmax.f32 %v2573_v16, 0.0  ;;  %v4703_v16 = vld [vmem:[%s7456_s5 + $0xb8] sm:$0xff] }
 0x260   : > { %v2576_v28 = vmax.f32 %v2572_v26, 0.0  ;;  %v5154_v29 = vpop.f32.mrb[2].mxu1 }
 0x261   : > { %v2585_v34 = vcombine.high %v2577_v12, %v2577_v12  ;;  %2595 = vst.msk [vmem:[#allocation3 + $0x8] sm:$0xf] %vm2592_vm2, %v2577_v12  ;;  %v2575_v35 = vadd.f32 %v5154_v29, %v4685_v14  ;;  %v2552_v23 = vpop.f32.mrb[3].mxu1  ;;  %v5515_v12 = vpack.c.bf16 %v4703_v16, %v4702_v15  ;;  %v4706_v29 = vld [vmem:[%s7456_s5 + $0xc8] sm:$0xff]  ;;  %v4748_v15 = vld [vmem:[%s7456_s5 + $0x1f8] sm:$0xff] }
 0x262   : > { %v2584_v37 = vcombine.high %v2576_v28, %v2576_v28  ;;  %2593 = vst.msk [vmem:[#allocation3] sm:$0xf] %vm2592_vm2, %v2576_v28  ;;  %v2574_v39 = vadd.f32 %v4685_v14, %v2552_v23  ;;  %v5512_v14 = vpack.c.bf16 %v4701_v18, %v4700_v50  ;;  %v4705_v28 = vld [vmem:[%s7456_s5 + $0xc0] sm:$0xff]  ;;  %v4707_v23 = vld [vmem:[%s7456_s5 + $0xd0] sm:$0xff]  ;;  %v4746_v50 = vld [vmem:[%s7456_s5 + $0x1e8] sm:$0xff] }
 0x263   : > { %2596 = vst.msk [vmem:[#allocation3 + $0xc] sm:$0xf] %vm2592_vm2, %v2585_v34  ;;  %v2579_v33 = vmax.f32 %v2575_v35, 0.0  ;;  %v5518_v34 = vpack.c.bf16 %v4706_v29, %v4705_v28  ;;  %v3615_v28 = vld [vmem:[%s7458_s7 + $0x108] sm:$0xff] }
 0x264   : > { %2594 = vst.msk [vmem:[#allocation3 + $0x4] sm:$0xf] %vm2592_vm2, %v2584_v37  ;;  %v2578_v40 = vmax.f32 %v2574_v39, 0.0  ;;  %v4708_v37 = vld [vmem:[%s7456_s5 + $0xd8] sm:$0xff]  ;;  %v3619_v29 = vld [vmem:[%s7458_s7 + $0x128] sm:$0xff] }
 0x265   : > { %v2587_v41 = vcombine.high %v2579_v33, %v2579_v33  ;;  %2599 = vst.msk [vmem:[#allocation3 + $0x18] sm:$0xf] %vm2592_vm2, %v2579_v33  ;;  %v5521_v39 = vpack.c.bf16 %v4708_v37, %v4707_v23  ;;  %v4709_v33 = vld [vmem:[%s7456_s5 + $0xe0] sm:$0xff] }
 0x266   : > { %v2586_v42 = vcombine.high %v2578_v40, %v2578_v40  ;;  %2597 = vst.msk [vmem:[#allocation3 + $0x10] sm:$0xf] %vm2592_vm2, %v2578_v40  ;;  %v4710_v40 = vld [vmem:[%s7456_s5 + $0xe8] sm:$0xff]  ;;  %v3614_v23 = vld [vmem:[%s7458_s7 + $0x100] sm:$0xff] }
 0x267   : > { %2600 = vst.msk [vmem:[#allocation3 + $0x1c] sm:$0xf] %vm2592_vm2, %v2587_v41  ;;  %v5524_v41 = vpack.c.bf16 %v4710_v40, %v4709_v33  ;;  %v3618_v37 = vld [vmem:[%s7458_s7 + $0x120] sm:$0xff]  ;;  %v3616_v40 = vld [vmem:[%s7458_s7 + $0x110] sm:$0xff] }
 0x268   : > { %2598 = vst.msk [vmem:[#allocation3 + $0x14] sm:$0xf] %vm2592_vm2, %v2586_v42  ;;  %v4711_v42 = vld [vmem:[%s7456_s5 + $0xf0] sm:$0xff]  ;;  %v5591_v33 = vpack.c.bf16 %v3618_v37, %v3614_v23 }
 0x26a   : > { %v5872_v45 = vld.sshfl [vmem:[#allocation3 + $0x8] sm:$0xf pattern:$0x76325410] }
 0x26b   : > { %v5874_v54 = vld.sshfl [vmem:[#allocation3 + $0x1] sm:$0xf pattern:$0x76325410] }
 0x26c   : > { %v5878_v6 = vld.sshfl [vmem:[#allocation3 + $0xa] sm:$0xf pattern:$0x76325410] }
 0x26d   : > { %v5879_v43 = vld.sshfl [vmem:[#allocation3] sm:$0xf pattern:$0x76325410] }
 0x26e   : > { %v5873_v52 = vld.sshfl [vmem:[#allocation3 + $0x18] sm:$0xf pattern:$0x76325410] }
 0x26f   : > { %v5875_v53 = vld.sshfl [vmem:[#allocation3 + $0x11] sm:$0xf pattern:$0x76325410]  ;;  %v3276_v57 = vcombine.low %v5872_v45, %v5873_v52  ;;  %v4712_v45 = vld [vmem:[%s7456_s5 + $0xf8] sm:$0xff]  ;;  %v4715_v52 = vld [vmem:[%s7456_s5 + $0x108] sm:$0xff] }
 0x270   : > { %v2646_v58 = vcombine.low %v5874_v54, %v5875_v53  ;;  %v5876_v48 = vld.sshfl [vmem:[#allocation3 + $0x1a] sm:$0xf pattern:$0x76325410]  ;;  %v5527_v54 = vpack.c.bf16 %v4712_v45, %v4711_v42  ;;  %v5530_v53 = vpack.c.bf16 %v4715_v52, %v4714_v51 }
 0x271   : > { %5286 = vmatmul.mubr.msk.f32.vlgmr.msra.gmra.mrb[4].mxu1 %vm2647_vm3, %v3276_v57  ;;  %v5877_v3 = vld.sshfl [vmem:[#allocation3 + $0x10] sm:$0xf pattern:$0x76325410]  ;;  %v3490_v20 = vcombine.low %v5878_v6, %v5876_v48  ;;  %v4730_v6 = vld [vmem:[%s7456_s5 + $0x178] sm:$0xff]  ;;  %v3623_v42 = vld [vmem:[%s7458_s7 + $0x148] sm:$0xff] }
 0x272   : > { %5579 = vmatpush3.bf16.msra.mxu1 %v5578_v32  ;;  %5172 = vmatmul.mubr.msk.f32.vlgmr.msra.gmra.mrb[14].mxu0 %vm2647_vm3, %v2646_v58  ;;  %v2740_v8 = vcombine.low %v5879_v43, %v5877_v3  ;;  %v5880_v22 = vld.sshfl [vmem:[#allocation3 + $0x12] sm:$0xf pattern:$0x76325410]  ;;  %v4716_v32 = vld [vmem:[%s7456_s5 + $0x110] sm:$0xff] }
 0x273   : > { %5495 = vmatpush3.bf16.msra.mxu0 %v5494_v25  ;;  %5580 = vmatprep.subr.bf16.mxu1 %v5898_v4  ;;  %v5881_v26 = vld.sshfl [vmem:[#allocation3 + $0x2] sm:$0xf pattern:$0x76325410]  ;;  %v5533_v57 = vpack.c.bf16 %v4717_v56, %v4716_v32  ;;  %v4718_v25 = vld [vmem:[%s7456_s5 + $0x120] sm:$0xff] }
 0x274   : > { %5496 = vmatprep.subr.bf16.mxu0 %v5898_v4  ;;  %5323 = vmatprep.mubr.msk.f32.mxu1 %vm5900_vm1, %v5901_v5  ;;  %v2846_v35 = vcombine.low %v5881_v26, %v5880_v22  ;;  %v5882_v46 = vld.sshfl [vmem:[#allocation3 + $0x14] sm:$0xf pattern:$0x76325410]  ;;  %v5536_v58 = vpack.c.bf16 %v4719_v38, %v4718_v25  ;;  %v4729_v3 = vld [vmem:[%s7456_s5 + $0x170] sm:$0xff] }
 0x275   : > { %5190 = vmatprep.mubr.msk.f32.mxu0 %vm5900_vm1, %v5901_v5  ;;  %v5883_v47 = vld.sshfl [vmem:[#allocation3 + $0x4] sm:$0xf pattern:$0x76325410]  ;;  %v4727_v48 = vld [vmem:[%s7456_s5 + $0x160] sm:$0xff]  ;;  %v3631_v25 = vld [vmem:[%s7458_s7 + $0x188] sm:$0xff] }
 0x276   : > { %5582 = vmatpush3.bf16.msra.mxu1 %v5581_v61  ;;  %v2954_v55 = vcombine.low %v5883_v47, %v5882_v46  ;;  %v5884_v61 = vld.sshfl [vmem:[#allocation3 + $0x15] sm:$0xf pattern:$0x76325410]  ;;  %v5548_v2 = vpack.c.bf16 %v4728_v1, %v4727_v48  ;;  %v3625_v47 = vld [vmem:[%s7458_s7 + $0x158] sm:$0xff]  ;;  %v3624_v32 = vld [vmem:[%s7458_s7 + $0x150] sm:$0xff] }
 0x277   : > { %5498 = vmatpush3.bf16.msra.mxu0 %v5497_v13  ;;  %5583 = vmatprep.subr.bf16.mxu1 %v5898_v4  ;;  %v5885_v21 = vld.sshfl [vmem:[#allocation3 + $0x5] sm:$0xf pattern:$0x76325410]  ;;  %v4723_v13 = vld [vmem:[%s7456_s5 + $0x140] sm:$0xff]  ;;  %v3627_v46 = vld [vmem:[%s7458_s7 + $0x168] sm:$0xff] }
 0x278   : > { %5499 = vmatprep.subr.bf16.mxu0 %v5898_v4  ;;  %v5542_v27 = vpack.c.bf16 %v4724_v24, %v4723_v13  ;;  %v5887_v43 = vld.sshfl [vmem:[#allocation3 + $0x6] sm:$0xf pattern:$0x76325410]  ;;  %v5593_v51 = vpack.c.bf16 %v3627_v46, %v3623_v42  ;;  %v3635_v38 = vld [vmem:[%s7458_s7 + $0x1a8] sm:$0xff]  ;;  %v3634_v13 = vld [vmem:[%s7458_s7 + $0x1a0] sm:$0xff] }
 0x279   : > { %v5888_v16 = vld.sshfl [vmem:[#allocation3 + $0x19] sm:$0xf pattern:$0x76325410]  ;;  %v5597_v59 = vpack.c.bf16 %v3635_v38, %v3631_v25  ;;  %v3632_v24 = vld [vmem:[%s7458_s7 + $0x190] sm:$0xff]  ;;  %v3584_v25 = vld [vmem:[%s7458_s7 + $0x20] sm:$0xff] }
 0x27a   : > { %5585 = vmatpush3.bf16.msra.mxu1 %v5584_v63  ;;  %v3061_v63 = vcombine.low %v5885_v21, %v5884_v61  ;;  %v5889_v22 = vld.sshfl [vmem:[#allocation3 + $0x9] sm:$0xf pattern:$0x76325410]  ;;  %v3630_v21 = vld [vmem:[%s7458_s7 + $0x180] sm:$0xff]  ;;  %v3582_v38 = vld [vmem:[%s7458_s7 + $0x10] sm:$0xff] }
 0x27b   : > { %5501 = vmatpush3.bf16.msra.mxu0 %v5500_v0  ;;  %5586 = vmatprep.subr.bf16.mxu1 %v5898_v4  ;;  %v4725_v0 = vld [vmem:[%s7456_s5 + $0x150] sm:$0xff]  ;;  %v3637_v61 = vld [vmem:[%s7458_s7 + $0x1b8] sm:$0xff] }
 0x27c   : > { %5502 = vmatprep.subr.bf16.mxu0 %v5898_v4  ;;  %v5545_v31 = vpack.c.bf16 %v4726_v30, %v4725_v0  ;;  %v3639_v0 = vld [vmem:[%s7458_s7 + $0x1c8] sm:$0xff] }
 0x27d   : > { %v3643_v30 = vld [vmem:[%s7458_s7 + $0x1e8] sm:$0xff] }
 0x27e   : > { %5588 = vmatpush3.bf16.msra.mxu1 %v5587_v7  ;;  %v5886_v7 = vld.sshfl [vmem:[#allocation3 + $0x16] sm:$0xf pattern:$0x76325410]  ;;  %v5601_v1 = vpack.c.bf16 %v3643_v30, %v3639_v0  ;;  %v3590_v30 = vld [vmem:[%s7458_s7 + $0x50] sm:$0xff] }
 0x27f   : > { %5504 = vmatpush3.bf16.msra.mxu0 %v5503_v49  ;;  %v5551_v49 = vpack.c.bf16 %v4730_v6, %v4729_v3  ;;  %v3638_v3 = vld [vmem:[%s7458_s7 + $0x1c0] sm:$0xff] }
 0x280   : > { %5505 = vmatprep.subr.bf16.mxu0 %v5898_v4  ;;  %v3642_v6 = vld [vmem:[%s7458_s7 + $0x1e0] sm:$0xff] }
 0x281   : > { %5324 = vmatmul.mubr.msk.f32.vlgmr.msra.gmra.mrb[6].mxu1 %vm2647_vm3, %v3490_v20  ;;  %v5566_v20 = vpack.c.bf16 %v4742_v19, %v4741_v17  ;;  %v3581_v17 = vld [vmem:[%s7458_s7 + $0x8] sm:$0xff]  ;;  %v3592_v0 = vld [vmem:[%s7458_s7 + $0x60] sm:$0xff] }
 0x282   : > { %5191 = vmatmul.mubr.msk.f32.vlgmr.msra.gmra.mrb[16].mxu0 %vm2647_vm3, %v2740_v8  ;;  %3788 = vmatprep.mubr.f32.mxu1 %v5901_v5  ;;  %v4743_v8 = vld [vmem:[%s7456_s5 + $0x1d0] sm:$0xff]  ;;  %v3585_v19 = vld [vmem:[%s7458_s7 + $0x28] sm:$0xff] }
 0x283   : > { %5507 = vmatpush3.bf16.msra.mxu0 %v5506_v36  ;;  %5209 = vmatprep.mubr.msk.f32.mxu0 %vm5900_vm1, %v5901_v5  ;;  %v3168_v36 = vcombine.low %v5887_v43, %v5886_v7  ;;  %v5569_v10 = vpack.c.bf16 %v4744_v9, %v4743_v8  ;;  %v3640_v43 = vld [vmem:[%s7458_s7 + $0x1d0] sm:$0xff]  ;;  %v5603_v8 = vpack.c.bf16 %v3642_v6, %v3638_v3  ;;  %v3597_v3 = vld [vmem:[%s7458_s7 + $0x88] sm:$0xff] }
 0x284   : > { %5508 = vmatprep.subr.bf16.mxu0 %v5898_v4 }
 0x287   : > { %5510 = vmatpush3.bf16.msra.mxu0 %v5509_v44  ;;  %v4745_v44 = vld [vmem:[%s7456_s5 + $0x1e0] sm:$0xff] }
 0x288   : > { %5511 = vmatprep.subr.bf16.mxu0 %v5898_v4  ;;  %v5572_v18 = vpack.c.bf16 %v4746_v50, %v4745_v44 }
 0x28b   : > { %5513 = vmatpush3.bf16.msra.mxu0 %v5512_v14  ;;  %v4747_v14 = vld [vmem:[%s7456_s5 + $0x1f0] sm:$0xff] }
 0x28c   : > { %5514 = vmatprep.subr.bf16.mxu0 %v5898_v4  ;;  %v5575_v26 = vpack.c.bf16 %v4748_v15, %v4747_v14 }
 0x28f   : > { %5516 = vmatpush3.bf16.msra.mxu0 %v5515_v12  ;;  %v3383_v12 = vcombine.low %v5889_v22, %v5888_v16 }
 0x290   : > { %5517 = vmatprep.subr.bf16.mxu0 %v5898_v4 }
 0x292   : > { %5210 = vmatmul.mubr.msk.f32.vlgmr.msra.gmra.mrb[18].mxu0 %vm2647_vm3, %v2846_v35  ;;  %v5589_v35 = vpack.c.bf16 %v3619_v29, %v3615_v28 }
 0x293   : > { %5519 = vmatpush3.bf16.msra.mxu0 %v5518_v34  ;;  %5228 = vmatprep.mubr.msk.f32.mxu0 %vm5900_vm1, %v5901_v5  ;;  %v3617_v34 = vld [vmem:[%s7458_s7 + $0x118] sm:$0xff] }
 0x294   : > { %5520 = vmatprep.subr.bf16.mxu0 %v5898_v4 }
 0x297   : > { %5522 = vmatpush3.bf16.msra.mxu0 %v5521_v39 }
 0x298   : > { %5523 = vmatprep.subr.bf16.mxu0 %v5898_v4 }
 0x29b   : > { %5525 = vmatpush3.bf16.msra.mxu0 %v5524_v41  ;;  %v3620_v41 = vld [vmem:[%s7458_s7 + $0x130] sm:$0xff] }
 0x29c   : > { %5526 = vmatprep.subr.bf16.mxu0 %v5898_v4  ;;  %v5607_v45 = vpack.c.bf16 %v3620_v41, %v3616_v40 }
 0x29f   : > { %5528 = vmatpush3.bf16.msra.mxu0 %v5527_v54  ;;  %v3629_v54 = vld [vmem:[%s7458_s7 + $0x178] sm:$0xff] }
 0x2a0   : > { %5529 = vmatprep.subr.bf16.mxu0 %v5898_v4  ;;  %v5609_v52 = vpack.c.bf16 %v3629_v54, %v3625_v47 }
 0x2a2   : > { %5229 = vmatmul.mubr.msk.f32.vlgmr.msra.gmra.mrb[20].mxu0 %vm2647_vm3, %v2954_v55  ;;  %v3626_v55 = vld [vmem:[%s7458_s7 + $0x160] sm:$0xff] }
 0x2a3   : > { %5531 = vmatpush3.bf16.msra.mxu0 %v5530_v53  ;;  %5247 = vmatprep.mubr.msk.f32.mxu0 %vm5900_vm1, %v5901_v5  ;;  %v3622_v53 = vld [vmem:[%s7458_s7 + $0x140] sm:$0xff] }
 0x2a4   : > { %5532 = vmatprep.subr.bf16.mxu0 %v5898_v4  ;;  %v5595_v56 = vpack.c.bf16 %v3626_v55, %v3622_v53 }
 0x2a7   : > { %5534 = vmatpush3.bf16.msra.mxu0 %v5533_v57  ;;  %v3628_v57 = vld [vmem:[%s7458_s7 + $0x170] sm:$0xff] }
 0x2a8   : > { %5535 = vmatprep.subr.bf16.mxu0 %v5898_v4 }
 0x2ab   : > { %5537 = vmatpush3.bf16.msra.mxu0 %v5536_v58  ;;  %v5611_v58 = vpack.c.bf16 %v3628_v57, %v3624_v32  ;;  %v3580_v57 = vld [vmem:[%s7458_s7] sm:$0xff] }
 0x2ac   : > { %5538 = vmatprep.subr.bf16.mxu0 %v5898_v4 }
 0x2af   : > { %5540 = vmatpush3.bf16.msra.mxu0 %v5539_v62  ;;  %v5613_v62 = vpack.c.bf16 %v3637_v61, %v3633_v60  ;;  %v3593_v60 = vld [vmem:[%s7458_s7 + $0x68] sm:$0xff]  ;;  %v3591_v61 = vld [vmem:[%s7458_s7 + $0x58] sm:$0xff] }
 0x2b0   : > { %5541 = vmatprep.subr.bf16.mxu0 %v5898_v4 }
 0x2b2   : > { %5248 = vmatmul.mubr.msk.f32.vlgmr.msra.gmra.mrb[22].mxu0 %vm2647_vm3, %v3061_v63  ;;  %v5599_v63 = vpack.c.bf16 %v3634_v13, %v3630_v21  ;;  %v3595_v21 = vld [vmem:[%s7458_s7 + $0x78] sm:$0xff] }
 0x2b3   : > { %5543 = vmatpush3.bf16.msra.mxu0 %v5542_v27  ;;  %5266 = vmatprep.mubr.msk.f32.mxu0 %vm5900_vm1, %v5901_v5  ;;  %v3636_v27 = vld [vmem:[%s7458_s7 + $0x1b0] sm:$0xff] }
 0x2b4   : > { %5544 = vmatprep.subr.bf16.mxu0 %v5898_v4  ;;  %v5615_v48 = vpack.c.bf16 %v3636_v27, %v3632_v24  ;;  %v5623_v24 = vpack.c.bf16 %v3584_v25, %v3580_v57 }
 0x2b7   : > { %5546 = vmatpush3.bf16.msra.mxu0 %v5545_v31  ;;  %v3641_v31 = vld [vmem:[%s7458_s7 + $0x1d8] sm:$0xff] }
 0x2b8   : > { %5547 = vmatprep.subr.bf16.mxu0 %v5898_v4 }
 0x2bb   : > { %5549 = vmatpush3.bf16.msra.mxu0 %v5548_v2  ;;  %v3645_v2 = vld [vmem:[%s7458_s7 + $0x1f8] sm:$0xff] }
 0x2bc   : > { %5550 = vmatprep.subr.bf16.mxu0 %v5898_v4  ;;  %v5617_v7 = vpack.c.bf16 %v3645_v2, %v3641_v31  ;;  %v3594_v2 = vld [vmem:[%s7458_s7 + $0x70] sm:$0xff] }
 0x2bf   : > { %5552 = vmatpush3.bf16.msra.mxu0 %v5551_v49  ;;  %v3644_v49 = vld [vmem:[%s7458_s7 + $0x1f0] sm:$0xff] }
 0x2c0   : > { %5565 = vmatprep.subr.bf16.mxu0 %v5898_v4  ;;  %v5619_v9 = vpack.c.bf16 %v3644_v49, %v3640_v43  ;;  %v3599_v43 = vld [vmem:[%s7458_s7 + $0x98] sm:$0xff] }
 0x2c1   : > { %v3603_v49 = vld [vmem:[%s7458_s7 + $0xb8] sm:$0xff] }
 0x2c2   : > { %5267 = vmatmul.mubr.msk.f32.vlgmr.msra.gmra.mrb[24].mxu0 %vm2647_vm3, %v3168_v36  ;;  %v3587_v36 = vld [vmem:[%s7458_s7 + $0x38] sm:$0xff] }
 0x2c3   : > { %5567 = vmatpush3.bf16.msra.mxu0 %v5566_v20  ;;  %5304 = vmatprep.mubr.msk.f32.mxu0 %vm5900_vm1, %v5901_v5  ;;  %v3583_v20 = vld [vmem:[%s7458_s7 + $0x18] sm:$0xff] }
 0x2c4   : > { %5568 = vmatprep.subr.bf16.mxu0 %v5898_v4  ;;  %v5637_v44 = vpack.c.bf16 %v3587_v36, %v3583_v20  ;;  %v3596_v20 = vld [vmem:[%s7458_s7 + $0x80] sm:$0xff] }
 0x2c5   : > { %v3600_v36 = vld [vmem:[%s7458_s7 + $0xa0] sm:$0xff] }
 0x2c7   : > { %5570 = vmatpush3.bf16.msra.mxu0 %v5569_v10  ;;  %v5621_v10 = vpack.c.bf16 %v3585_v19, %v3581_v17  ;;  %v5643_v19 = vpack.c.bf16 %v3594_v2, %v3590_v30 }
 0x2c8   : > { %5571 = vmatprep.subr.bf16.mxu0 %v5898_v4 }
 0x2cb   : > { %5573 = vmatpush3.bf16.msra.mxu0 %v5572_v18 }
 0x2cc   : > { %5574 = vmatprep.subr.bf16.mxu0 %v5898_v4  ;;  %v3621_v4 = vld [vmem:[%s7458_s7 + $0x138] sm:$0xff] }
 0x2cd   : > { %v5605_v39 = vpack.c.bf16 %v3621_v4, %v3617_v34 }
 0x2cf   : > { %5576 = vmatpush3.bf16.msra.mxu0 %v5575_v26  ;;  %5606 = vmatprep.subr.bf16.mxu1 %v5605_v39 }
 0x2d0   : > { %5590 = vmatprep.subr.bf16.mxu0 %v5589_v35  ;;  %5608 = vmatpush1.bf16.msra.mxu1 %v5607_v45 }
 0x2d1   : > { %5610 = vmatprep.subr.bf16.mxu1 %v5609_v52  ;;  %v4759_v52 = vld [vmem:[%s7457_s6] ss:$0 sm:$0xff] }
 0x2d2   : > { %5305 = vmatmul.mubr.msk.f32.vlgmr.msra.gmra.mrb[26].mxu0 %vm2647_vm3, %v3383_v12 }
 0x2d3   : > { %3717 = vmatprep.mubr.f32.mxu0 %v5901_v5  ;;  %5592 = vmatpush1.bf16.msra.mxu0 %v5591_v33 }
 0x2d4   : > { %5594 = vmatprep.subr.bf16.mxu0 %v5593_v51  ;;  %5612 = vmatpush1.bf16.msra.mxu1 %v5611_v58  ;;  %v3586_v58 = vld [vmem:[%s7458_s7 + $0x30] sm:$0xff] }
 0x2d5   : > { %5614 = vmatprep.subr.bf16.mxu1 %v5613_v62  ;;  %v5639_v27 = vpack.c.bf16 %v3586_v58, %v3582_v38  ;;  %v3953_v38 = vld [vmem:[%s7458_s7 + $0x240] sm:$0xff] }
 0x2d6   : > { %v3957_v58 = vld [vmem:[%s7458_s7 + $0x260] sm:$0xff] }
 0x2d7   : > { %5596 = vmatpush1.bf16.msra.mxu0 %v5595_v56  ;;  %v5659_v30 = vpack.c.bf16 %v3957_v58, %v3953_v38  ;;  %v4150_v38 = vld [vmem:[%s7458_s7 + $0x398] sm:$0xff] }
 0x2d8   : > { %5598 = vmatprep.subr.bf16.mxu0 %v5597_v59  ;;  %5616 = vmatpush1.bf16.msra.mxu1 %v5615_v48  ;;  %v3589_v59 = vld [vmem:[%s7458_s7 + $0x48] sm:$0xff]  ;;  %v4154_v58 = vld [vmem:[%s7458_s7 + $0x3b8] sm:$0xff] }
 0x2d9   : > { %5618 = vmatprep.subr.bf16.mxu1 %v5617_v7  ;;  %v5625_v48 = vpack.c.bf16 %v3593_v60, %v3589_v59  ;;  %v3601_v7 = vld [vmem:[%s7458_s7 + $0xa8] sm:$0xff]  ;;  %v3955_v59 = vld [vmem:[%s7458_s7 + $0x250] sm:$0xff] }
 0x2db   : > { %5600 = vmatpush1.bf16.msra.mxu0 %v5599_v63  ;;  %v3588_v63 = vld [vmem:[%s7458_s7 + $0x40] sm:$0xff] }
 0x2dc   : > { %5602 = vmatprep.subr.bf16.mxu0 %v5601_v1  ;;  %5620 = vmatpush1.bf16.msra.mxu1 %v5619_v9  ;;  %v5641_v1 = vpack.c.bf16 %v3595_v21, %v3591_v61  ;;  %v5627_v17 = vpack.c.bf16 %v3592_v0, %v3588_v63  ;;  %v5645_v9 = vpack.c.bf16 %v3603_v49, %v3599_v43  ;;  %v3964_v63 = vld [vmem:[%s7458_s7 + $0x298] sm:$0xff]  ;;  %v3970_v43 = vld [vmem:[%s7458_s7 + $0x2c8] sm:$0xff] }
 0x2dd   : > { %5638 = vmatprep.subr.bf16.mxu1 %v5637_v44  ;;  %v3602_v44 = vld [vmem:[%s7458_s7 + $0xb0] sm:$0xff]  ;;  %v3968_v0 = vld [vmem:[%s7458_s7 + $0x2b8] sm:$0xff]  ;;  %v3974_v49 = vld [vmem:[%s7458_s7 + $0x2e8] sm:$0xff] }
 0x2df   : > { %5604 = vmatpush1.bf16.msra.mxu0 %v5603_v8  ;;  %v5629_v8 = vpack.c.bf16 %v3601_v7, %v3597_v3  ;;  %v5677_v3 = vpack.c.bf16 %v3968_v0, %v3964_v63  ;;  %v3967_v7 = vld [vmem:[%s7458_s7 + $0x2b0] sm:$0xff]  ;;  %v4156_v63 = vld [vmem:[%s7458_s7 + $0x3c8] sm:$0xff] }
 0x2e0   : > { %5622 = vmatprep.subr.bf16.mxu0 %v5621_v10  ;;  %v3598_v10 = vld [vmem:[%s7458_s7 + $0x90] sm:$0xff]  ;;  %v4160_v0 = vld [vmem:[%s7458_s7 + $0x3e8] sm:$0xff] }
 0x344   : > { %v3345_v50 = vpop.f32.mrb[4].mxu1 }
 0x345   : > { %v2716_v18 = vpop.f32.mrb[14].mxu0  ;;  %v5287_v14 = vpop.f32.mrb[5].mxu1 }
 0x346   : > { %v5173_v15 = vpop.f32.mrb[15].mxu0  ;;  %v3607_v14 = vld [vmem:[%s7458_s7 + $0xd8] sm:$0xff] }
 0x347   : > { %v3611_v15 = vld [vmem:[%s7458_s7 + $0xf8] sm:$0xff] }
 0x354   : > { %v3559_v16 = vpop.f32.mrb[6].mxu1 }
 0x355   : > { %v2809_v22 = vpop.f32.mrb[16].mxu0  ;;  %v5325_v26 = vpop.f32.mrb[7].mxu1 }
 0x356   : > { %v2810_v12 = vadd.f32 %v2809_v22, %v2716_v18  ;;  %v5192_v28 = vpop.f32.mrb[17].mxu0  ;;  %v3609_v18 = vld [vmem:[%s7458_s7 + $0xe8] sm:$0xff]  ;;  %v5647_v22 = vpack.c.bf16 %v3602_v44, %v3598_v10  ;;  %v3604_v26 = vld [vmem:[%s7458_s7 + $0xc0] sm:$0xff]  ;;  %v5665_v10 = vpack.c.bf16 %v3974_v49, %v3970_v43  ;;  %v4161_v43 = vld [vmem:[%s7458_s7 + $0x3f0] sm:$0xff] }
 0x357   : > { %v4361_v49 = vld [vmem:[%s7460_s9 + $0x80] sm:$0xff] }
 0x365   : > { %v2915_v29 = vpop.f32.mrb[18].mxu0 }
 0x366   : > { %v2919_v34 = vadd.f32 %v2915_v29, %v2810_v12  ;;  %v5211_v35 = vpop.f32.mrb[19].mxu0  ;;  %v3608_v12 = vld [vmem:[%s7458_s7 + $0xe0] sm:$0xff]  ;;  %v5649_v29 = vpack.c.bf16 %v3611_v15, %v3607_v14  ;;  %v4132_v14 = vld [vmem:[%s7458_s7 + $0x308] sm:$0xff] }
 0x367   : > { %v3610_v35 = vld [vmem:[%s7458_s7 + $0xf0] sm:$0xff]  ;;  %v4136_v15 = vld [vmem:[%s7458_s7 + $0x328] sm:$0xff] }
 0x375   : > { %v3023_v4 = vpop.f32.mrb[20].mxu0 }
 0x376   : > { %v3027_v23 = vadd.f32 %v3023_v4, %v2919_v34  ;;  %v5230_v37 = vpop.f32.mrb[21].mxu0  ;;  %v3606_v34 = vld [vmem:[%s7458_s7 + $0xd0] sm:$0xff]  ;;  %v3946_v4 = vld [vmem:[%s7458_s7 + $0x208] sm:$0xff] }
 0x377   : > { %v3948_v37 = vld [vmem:[%s7458_s7 + $0x218] sm:$0xff] }
 0x385   : > { %v3130_v39 = vpop.f32.mrb[22].mxu0 }
 0x386   : > { %v3134_v33 = vadd.f32 %v3130_v39, %v3027_v23  ;;  %v5249_v40 = vpop.f32.mrb[23].mxu0  ;;  %v3950_v23 = vld [vmem:[%s7458_s7 + $0x228] sm:$0xff]  ;;  %v3952_v39 = vld [vmem:[%s7458_s7 + $0x238] sm:$0xff] }
 0x387   : > { %v5635_v40 = vpack.c.bf16 %v3608_v12, %v3604_v26 }
 0x395   : > { %v3237_v41 = vpop.f32.mrb[24].mxu0 }
 0x396   : > { %v3241_v42 = vadd.f32 %v3237_v41, %v3134_v33  ;;  %v5268_v45 = vpop.f32.mrb[25].mxu0  ;;  %v5651_v41 = vpack.c.bf16 %v3610_v35, %v3606_v34  ;;  %v4135_v34 = vld [vmem:[%s7458_s7 + $0x320] sm:$0xff]  ;;  %v5685_v35 = vpack.c.bf16 %v4136_v15, %v4132_v14  ;;  %v4378_v15 = vld [vmem:[%s7460_s9 + $0x108] sm:$0xff] }
 0x397   : > { %v3949_v45 = vld [vmem:[%s7458_s7 + $0x220] sm:$0xff] }
 0x398   : > { %v3349_v46 = vadd.f32 %v3345_v50, %v3241_v42  ;;  %v3605_v50 = vld [vmem:[%s7458_s7 + $0xc8] sm:$0xff]  ;;  %v3945_v42 = vld [vmem:[%s7458_s7 + $0x200] sm:$0xff] }
 0x399   : > { %v5633_v28 = vpack.c.bf16 %v3609_v18, %v3605_v50  ;;  %v5655_v57 = vpack.c.bf16 %v3949_v45, %v3945_v42  ;;  %v3971_v50 = vld [vmem:[%s7458_s7 + $0x2d0] sm:$0xff]  ;;  %v4146_v42 = vld [vmem:[%s7458_s7 + $0x378] sm:$0xff]  ;;  %v4377_v14 = vld [vmem:[%s7460_s9 + $0x100] sm:$0xff] }
 0x39a   : > { %v3975_v18 = vld [vmem:[%s7458_s7 + $0x2f0] sm:$0xff] }
 0x3a5   : > { %v3452_v47 = vpop.f32.mrb[26].mxu0 }
 0x3a6   : > { %v3456_v54 = vadd.f32 %v3452_v47, %v3349_v46  ;;  %v5306_v51 = vpop.f32.mrb[27].mxu0  ;;  %v5653_v46 = vpack.c.bf16 %v3950_v23, %v3946_v4  ;;  %v5669_v47 = vpack.c.bf16 %v3952_v39, %v3948_v37  ;;  %v4133_v23 = vld [vmem:[%s7458_s7 + $0x310] sm:$0xff]  ;;  %v4140_v39 = vld [vmem:[%s7458_s7 + $0x348] sm:$0xff] }
 0x3a7   : > { %v3951_v51 = vld [vmem:[%s7458_s7 + $0x230] sm:$0xff] }
 0x3a8   : > { %v3563_v53 = vadd.f32 %v3559_v16, %v3456_v54  ;;  %v5631_v16 = vpack.c.bf16 %v3600_v36, %v3596_v20  ;;  %v3947_v54 = vld [vmem:[%s7458_s7 + $0x210] sm:$0xff] }
 0x3a9   : > { %v5671_v25 = vpack.c.bf16 %v3951_v51, %v3947_v54  ;;  %v4137_v37 = vld [vmem:[%s7458_s7 + $0x330] sm:$0xff]  ;;  %v4143_v54 = vld [vmem:[%s7458_s7 + $0x360] sm:$0xff] }
 0x3aa   : > { %v3571_v55 = vadd.f32 %v4759_v52, %v3563_v53  ;;  %v3954_v52 = vld [vmem:[%s7458_s7 + $0x248] sm:$0xff]  ;;  %v4141_v51 = vld [vmem:[%s7458_s7 + $0x350] sm:$0xff] }
 0x3ac   : > { %v3572_v32 = vmax.f32 %v3571_v55, 0.0  ;;  %v3958_v55 = vld [vmem:[%s7458_s7 + $0x268] sm:$0xff] }
 0x3ad   : > { %v5657_v61 = vpack.c.bf16 %v3958_v55, %v3954_v52 }
 0x3ae   : > { %v3574_v56 = vcombine.high %v3572_v32, %v3572_v32  ;;  %3576 = vst.msk [vmem:[#allocation4] sm:$0xf] %vm2592_vm2, %v3572_v32  ;;  %v3956_v32 = vld [vmem:[%s7458_s7 + $0x258] sm:$0xff] }
 0x3b0   : > { %3577 = vst.msk [vmem:[#allocation4 + $0x4] sm:$0xf] %vm2592_vm2, %v3574_v56  ;;  %v3960_v56 = vld [vmem:[%s7458_s7 + $0x278] sm:$0xff] }
 0x3b1   : > { %v5673_v21 = vpack.c.bf16 %v3960_v56, %v3956_v32  ;;  %v4145_v32 = vld [vmem:[%s7458_s7 + $0x370] sm:$0xff]  ;;  %v4148_v56 = vld [vmem:[%s7458_s7 + $0x388] sm:$0xff] }
 0x3b5   : > { %v3612_v31 = vld [vmem:[#allocation4 + $0x1] sm:$0x1]  ;;  %v3578_v60 = vld [vmem:[#allocation4] sm:$0x1]  ;;  %v3943_v52 = vld [vmem:[#allocation4 + $0x2] sm:$0x1] }
 0x3b7   : > { %v3613_v62 = vld [vmem:[#allocation4 + $0x5] sm:$0x1]  ;;  %v3579_v33 = vld [vmem:[#allocation4 + $0x4] sm:$0x1]  ;;  %v3944_v26 = vld [vmem:[#allocation4 + $0x6] sm:$0x1] }
 0x3b8   : > { %v3648_v13 = vrot.slane %v3613_v62, 7  ;;  %v3797_v53 = vrot.slane %v3579_v33, 7  ;;  %v3959_v62 = vld [vmem:[%s7458_s7 + $0x270] sm:$0xff]  ;;  %v3979_v33 = vrot.slane %v3944_v26, 7  ;;  %v4364_v26 = vld [vmem:[%s7460_s9 + $0x98] sm:$0xff] }
 0x3ba   : > { %v3650_v6 = vsel %vm3649_vm4, %v3648_v13, %v3612_v31  ;;  %v3962_v13 = vld [vmem:[%s7458_s7 + $0x288] sm:$0xff]  ;;  %v5675_v31 = vpack.c.bf16 %v3959_v62, %v3955_v59 }
 0x3bb   : > { %4760 = vmatmul.mubr.msk.f32.vlgmr.msra.gmra.mrb[28].mxu0 %vm2647_vm3, %v3650_v6  ;;  %4761 = vmatmul.mubr.msk.f32.vlgmr.msra.gmra.mrb[8].mxu1 %vm2647_vm3, %v3650_v6  ;;  %v3963_v6 = vld [vmem:[%s7458_s7 + $0x290] sm:$0xff] }
 0x3bc   : > { %5624 = vmatpush1.bf16.msra.mxu0 %v5623_v24  ;;  %5640 = vmatpush1.bf16.msra.mxu1 %v5639_v27  ;;  %v3798_v24 = vsel %vm3649_vm4, %v3797_v53, %v3578_v60  ;;  %v3966_v27 = vld [vmem:[%s7458_s7 + $0x2a8] sm:$0xff]  ;;  %v5679_v36 = vpack.c.bf16 %v3967_v7, %v3963_v6  ;;  %v5707_v60 = vpack.c.bf16 %v4145_v32, %v4141_v51 }
 0x3bd   : > { %5626 = vmatprep.subr.bf16.mxu0 %v5625_v48  ;;  %5642 = vmatprep.subr.bf16.mxu1 %v5641_v1  ;;  %v3961_v48 = vld [vmem:[%s7458_s7 + $0x280] sm:$0xff]  ;;  %v5661_v2 = vpack.c.bf16 %v3966_v27, %v3962_v13  ;;  %v5709_v13 = vpack.c.bf16 %v4154_v58, %v4150_v38  ;;  %v4153_v27 = vld [vmem:[%s7458_s7 + $0x3b0] sm:$0xff]  ;;  %v5697_v6 = vpack.c.bf16 %v4160_v0, %v4156_v63  ;;  %v4368_v38 = vld [vmem:[%s7460_s9 + $0xb8] sm:$0xff] }
 0x3be   : > { %3865 = vmatprep.mubr.f32.mxu0 %v5901_v5  ;;  %3936 = vmatprep.mubr.f32.mxu1 %v5901_v5  ;;  %v3965_v1 = vld [vmem:[%s7458_s7 + $0x2a0] sm:$0xff]  ;;  %v4399_v58 = vld [vmem:[%s7460_s9 + $0x1b0] sm:$0xff]  ;;  %v4384_v63 = vld [vmem:[%s7460_s9 + $0x138] sm:$0xff] }
 0x3bf   : > { %v5663_v20 = vpack.c.bf16 %v3965_v1, %v3961_v48  ;;  %v4369_v0 = vld [vmem:[%s7460_s9 + $0xc0] sm:$0xff] }
 0x3c0   : > { %5628 = vmatpush1.bf16.msra.mxu0 %v5627_v17  ;;  %5644 = vmatpush1.bf16.msra.mxu1 %v5643_v19  ;;  %v3972_v17 = vld [vmem:[%s7458_s7 + $0x2d8] sm:$0xff] }
 0x3c1   : > { %5630 = vmatprep.subr.bf16.mxu0 %v5629_v8  ;;  %5646 = vmatprep.subr.bf16.mxu1 %v5645_v9  ;;  %v3976_v19 = vld [vmem:[%s7458_s7 + $0x2f8] sm:$0xff]  ;;  %v3969_v8 = vld [vmem:[%s7458_s7 + $0x2c0] sm:$0xff] }
 0x3c2   : > { %v3973_v9 = vld [vmem:[%s7458_s7 + $0x2e0] sm:$0xff]  ;;  %v5681_v44 = vpack.c.bf16 %v3976_v19, %v3972_v17  ;;  %v4362_v17 = vld [vmem:[%s7460_s9 + $0x88] sm:$0xff] }
 0x3c3   : > { %v5667_v12 = vpack.c.bf16 %v3973_v9, %v3969_v8  ;;  %v4393_v19 = vld [vmem:[%s7460_s9 + $0x180] sm:$0xff] }
 0x3c4   : > { %5632 = vmatpush1.bf16.msra.mxu0 %v5631_v16  ;;  %5648 = vmatpush1.bf16.msra.mxu1 %v5647_v22  ;;  %v4134_v16 = vld [vmem:[%s7458_s7 + $0x318] sm:$0xff] }
 0x3c5   : > { %5634 = vmatprep.subr.bf16.mxu0 %v5633_v28  ;;  %5650 = vmatprep.subr.bf16.mxu1 %v5649_v29  ;;  %v4138_v22 = vld [vmem:[%s7458_s7 + $0x338] sm:$0xff]  ;;  %v5683_v28 = vpack.c.bf16 %v3975_v18, %v3971_v50  ;;  %v4131_v29 = vld [vmem:[%s7458_s7 + $0x300] sm:$0xff]  ;;  %v5717_v50 = vpack.c.bf16 %v4362_v17, %v4361_v49  ;;  %v4386_v49 = vld [vmem:[%s7460_s9 + $0x148] sm:$0xff] }
 0x3c6   : > { %v5701_v4 = vpack.c.bf16 %v4138_v22, %v4134_v16  ;;  %v5687_v45 = vpack.c.bf16 %v4135_v34, %v4131_v29  ;;  %v4363_v16 = vld [vmem:[%s7460_s9 + $0x90] sm:$0xff]  ;;  %v5751_v34 = vpack.c.bf16 %v4378_v15, %v4377_v14  ;;  %v4388_v15 = vld [vmem:[%s7460_s9 + $0x158] sm:$0xff] }
 0x3c7   : > { %v4371_v17 = vld [vmem:[%s7460_s9 + $0xd0] sm:$0xff] }
 0x3c8   : > { %5636 = vmatpush1.bf16.msra.mxu0 %v5635_v40  ;;  %5652 = vmatpush1.bf16.msra.mxu1 %v5651_v41  ;;  %v4144_v40 = vld [vmem:[%s7458_s7 + $0x368] sm:$0xff]  ;;  %v4142_v41 = vld [vmem:[%s7458_s7 + $0x358] sm:$0xff]  ;;  %v4387_v14 = vld [vmem:[%s7460_s9 + $0x150] sm:$0xff] }
 0x3c9   : > { %5654 = vmatprep.subr.bf16.mxu0 %v5653_v46  ;;  %5670 = vmatprep.subr.bf16.mxu1 %v5669_v47  ;;  %v5703_v46 = vpack.c.bf16 %v4137_v37, %v4133_v23  ;;  %v4139_v47 = vld [vmem:[%s7458_s7 + $0x340] sm:$0xff]  ;;  %v5689_v53 = vpack.c.bf16 %v4144_v40, %v4140_v39  ;;  %v5705_v55 = vpack.c.bf16 %v4146_v42, %v4142_v41  ;;  %v4379_v23 = vld [vmem:[%s7460_s9 + $0x110] sm:$0xff]  ;;  %v4380_v40 = vld [vmem:[%s7460_s9 + $0x118] sm:$0xff] }
 0x3ca   : > { %v5691_v59 = vpack.c.bf16 %v4143_v54, %v4139_v47  ;;  %v4129_v37 = vld [vmem:[#allocation4 + $0x3] sm:$0x1]  ;;  %v5721_v39 = vpack.c.bf16 %v4364_v26, %v4363_v16  ;;  %v4365_v41 = vld [vmem:[%s7460_s9 + $0xa0] sm:$0xff]  ;;  %v4398_v47 = vld [vmem:[%s7460_s9 + $0x1a8] sm:$0xff]  ;;  %v5755_v51 = vpack.c.bf16 %v4380_v40, %v4379_v23 }
 0x3cb   : > { %4762 = vmatmul.mubr.msk.f32.vlgmr.msra.gmra.mrb[28].mxu0 %vm2647_vm3, %v3798_v24  ;;  %4763 = vmatmul.mubr.msk.f32.vlgmr.msra.gmra.mrb[8].mxu1 %vm2647_vm3, %v3798_v24  ;;  %v4149_v24 = vld [vmem:[%s7458_s7 + $0x390] sm:$0xff]  ;;  %v4373_v16 = vld [vmem:[%s7460_s9 + $0xe0] sm:$0xff]  ;;  %v4358_v23 = vld [vmem:[%s7460_s9 + $0x68] sm:$0xff] }
 0x3cc   : > { %5656 = vmatpush1.bf16.msra.mxu0 %v5655_v57  ;;  %5672 = vmatpush1.bf16.msra.mxu1 %v5671_v25  ;;  %v3980_v57 = vsel %vm3649_vm4, %v3979_v33, %v3943_v52  ;;  %v4152_v25 = vld [vmem:[%s7458_s7 + $0x3a8] sm:$0xff]  ;;  %v5711_v1 = vpack.c.bf16 %v4153_v27, %v4149_v24  ;;  %v4349_v52 = vld [vmem:[%s7460_s9 + $0x20] sm:$0xff]  ;;  %v4383_v27 = vld [vmem:[%s7460_s9 + $0x130] sm:$0xff] }
 0x3cd   : > { %5658 = vmatprep.subr.bf16.mxu0 %v5657_v61  ;;  %5674 = vmatprep.subr.bf16.mxu1 %v5673_v21  ;;  %v4147_v61 = vld [vmem:[%s7458_s7 + $0x380] sm:$0xff]  ;;  %v5693_v62 = vpack.c.bf16 %v4152_v25, %v4148_v56  ;;  %v4367_v25 = vld [vmem:[%s7460_s9 + $0xb0] sm:$0xff] }
 0x3ce   : > { %4047 = vmatprep.mubr.f32.mxu0 %v5901_v5  ;;  %4118 = vmatprep.mubr.f32.mxu1 %v5901_v5  ;;  %v4151_v21 = vld [vmem:[%s7458_s7 + $0x3a0] sm:$0xff]  ;;  %v4375_v40 = vld [vmem:[%s7460_s9 + $0xf0] sm:$0xff] }
 0x3cf   : > { %v5695_v48 = vpack.c.bf16 %v4151_v21, %v4147_v61  ;;  %v4381_v56 = vld [vmem:[%s7460_s9 + $0x120] sm:$0xff]  ;;  %v4351_v21 = vld [vmem:[%s7460_s9 + $0x30] sm:$0xff] }
 0x3d0   : > { %5660 = vmatpush1.bf16.msra.mxu0 %v5659_v30  ;;  %5676 = vmatpush1.bf16.msra.mxu1 %v5675_v31  ;;  %v4158_v30 = vld [vmem:[%s7458_s7 + $0x3d8] sm:$0xff]  ;;  %v4405_v26 = vld [vmem:[%s7460_s9 + $0x1e0] sm:$0xff] }
 0x3d1   : > { %5662 = vmatprep.subr.bf16.mxu0 %v5661_v2  ;;  %5678 = vmatprep.subr.bf16.mxu1 %v5677_v3  ;;  %v4162_v31 = vld [vmem:[%s7458_s7 + $0x3f8] sm:$0xff]  ;;  %v4155_v2 = vld [vmem:[%s7458_s7 + $0x3c0] sm:$0xff] }
 0x3d2   : > { %v4159_v3 = vld [vmem:[%s7458_s7 + $0x3e0] sm:$0xff]  ;;  %v5713_v7 = vpack.c.bf16 %v4162_v31, %v4158_v30  ;;  %v4370_v30 = vld [vmem:[%s7460_s9 + $0xc8] sm:$0xff] }
 0x3d3   : > { %v5699_v8 = vpack.c.bf16 %v4159_v3, %v4155_v2  ;;  %v4401_v31 = vld [vmem:[%s7460_s9 + $0x1c0] sm:$0xff]  ;;  %v5763_v2 = vpack.c.bf16 %v4384_v63, %v4383_v27 }
 0x3d4   : > { %5664 = vmatpush1.bf16.msra.mxu0 %v5663_v20  ;;  %5680 = vmatpush1.bf16.msra.mxu1 %v5679_v36  ;;  %v4394_v20 = vld [vmem:[%s7460_s9 + $0x188] sm:$0xff]  ;;  %v4130_v36 = vld [vmem:[#allocation4 + $0x7] sm:$0x1]  ;;  %v4353_v3 = vld [vmem:[%s7460_s9 + $0x40] sm:$0xff] }
 0x3d5   : > { %5666 = vmatprep.subr.bf16.mxu0 %v5665_v10  ;;  %5682 = vmatprep.subr.bf16.mxu1 %v5681_v44  ;;  %v4345_v10 = vld [vmem:[%s7460_s9] sm:$0xff]  ;;  %v4346_v44 = vld [vmem:[%s7460_s9 + $0x8] sm:$0xff]  ;;  %v5749_v18 = vpack.c.bf16 %v4394_v20, %v4393_v19  ;;  %v4165_v22 = vrot.slane %v4130_v36, 7  ;;  %v4372_v19 = vld [vmem:[%s7460_s9 + $0xd8] sm:$0xff] }
 0x3d6   : > { %v5719_v29 = vpack.c.bf16 %v4346_v44, %v4345_v10  ;;  %v4403_v20 = vld [vmem:[%s7460_s9 + $0x1d0] sm:$0xff]  ;;  %v4404_v36 = vld [vmem:[%s7460_s9 + $0x1d8] sm:$0xff] }
 0x3d7   : > { %v4166_v42 = vsel %vm3649_vm4, %v4165_v22, %v4129_v37  ;;  %v4355_v10 = vld [vmem:[%s7460_s9 + $0x50] sm:$0xff]  ;;  %v4356_v44 = vld [vmem:[%s7460_s9 + $0x58] sm:$0xff]  ;;  %v4374_v22 = vld [vmem:[%s7460_s9 + $0xe8] sm:$0xff] }
 0x3d8   : > { %5668 = vmatpush1.bf16.msra.mxu0 %v5667_v12  ;;  %5684 = vmatpush1.bf16.msra.mxu1 %v5683_v28  ;;  %v4395_v12 = vld [vmem:[%s7460_s9 + $0x190] sm:$0xff]  ;;  %v4396_v28 = vld [vmem:[%s7460_s9 + $0x198] sm:$0xff]  ;;  %v4389_v37 = vld [vmem:[%s7460_s9 + $0x160] sm:$0xff] }
 0x3d9   : > { %5686 = vmatprep.subr.bf16.mxu0 %v5685_v35  ;;  %5702 = vmatprep.subr.bf16.mxu1 %v5701_v4  ;;  %v4347_v35 = vld [vmem:[%s7460_s9 + $0x10] sm:$0xff]  ;;  %v4348_v4 = vld [vmem:[%s7460_s9 + $0x18] sm:$0xff]  ;;  %v5753_v33 = vpack.c.bf16 %v4396_v28, %v4395_v12  ;;  %v4406_v12 = vld [vmem:[%s7460_s9 + $0x1e8] sm:$0xff]  ;;  %v5739_v28 = vpack.c.bf16 %v4356_v44, %v4355_v10 }
 0x3da   : > { %v5723_v54 = vpack.c.bf16 %v4348_v4, %v4347_v35  ;;  %v5773_v35 = vpack.c.bf16 %v4406_v12, %v4405_v26  ;;  %v4357_v4 = vld [vmem:[%s7460_s9 + $0x60] sm:$0xff] }
 0x3db   : > { %4764 = vmatmul.mubr.msk.f32.vlgmr.msra.gmra.mrb[28].mxu0 %vm2647_vm3, %v3980_v57  ;;  %4765 = vmatmul.mubr.msk.f32.vlgmr.msra.gmra.mrb[8].mxu1 %vm2647_vm3, %v3980_v57  ;;  %v4382_v57 = vld [vmem:[%s7460_s9 + $0x128] sm:$0xff] }
 0x3dc   : > { %5688 = vmatpush1.bf16.msra.mxu0 %v5687_v45  ;;  %5704 = vmatpush1.bf16.msra.mxu1 %v5703_v46  ;;  %v4366_v45 = vld [vmem:[%s7460_s9 + $0xa8] sm:$0xff]  ;;  %v4397_v46 = vld [vmem:[%s7460_s9 + $0x1a0] sm:$0xff]  ;;  %v5759_v61 = vpack.c.bf16 %v4382_v57, %v4381_v56  ;;  %v4319_v57 = vsub.s32 0, %v5991_v11 }
 0x3dd   : > { %5690 = vmatprep.subr.bf16.mxu0 %v5689_v53  ;;  %5706 = vmatprep.subr.bf16.mxu1 %v5705_v55  ;;  %v4350_v53 = vld [vmem:[%s7460_s9 + $0x28] sm:$0xff]  ;;  %v5725_v55 = vpack.c.bf16 %v4366_v45, %v4365_v41  ;;  %v5757_v32 = vpack.c.bf16 %v4398_v47, %v4397_v46  ;;  %v4376_v41 = vld [vmem:[%s7460_s9 + $0xf8] sm:$0xff]  ;;  %v4407_v46 = vld [vmem:[%s7460_s9 + $0x1f0] sm:$0xff] }
 0x3de   : > { %4233 = vmatprep.mubr.f32.mxu0 %v5901_v5  ;;  %4304 = vmatprep.mubr.f32.mxu1 %v5901_v5  ;;  %v4157_v5 = vld [vmem:[%s7458_s7 + $0x3d0] sm:$0xff]  ;;  %v5745_v45 = vpack.c.bf16 %v4376_v41, %v4375_v40  ;;  %v4408_v47 = vld [vmem:[%s7460_s9 + $0x1f8] sm:$0xff] }
 0x3df   : > { %v5715_v9 = vpack.c.bf16 %v4161_v43, %v4157_v5  ;;  %v4385_v43 = vld [vmem:[%s7460_s9 + $0x140] sm:$0xff] }
 0x3e0   : > { %5692 = vmatpush1.bf16.msra.mxu0 %v5691_v59  ;;  %5708 = vmatpush1.bf16.msra.mxu1 %v5707_v60  ;;  %v4400_v59 = vld [vmem:[%s7460_s9 + $0x1b8] sm:$0xff]  ;;  %v5727_v60 = vpack.c.bf16 %v4350_v53, %v4349_v52  ;;  %v4391_v53 = vld [vmem:[%s7460_s9 + $0x170] sm:$0xff] }
 0x3e1   : > { %5694 = vmatprep.subr.bf16.mxu0 %v5693_v62  ;;  %5710 = vmatprep.subr.bf16.mxu1 %v5709_v13  ;;  %v4352_v62 = vld [vmem:[%s7460_s9 + $0x38] sm:$0xff]  ;;  %v5729_v13 = vpack.c.bf16 %v4368_v38, %v4367_v25  ;;  %v5761_v24 = vpack.c.bf16 %v4400_v59, %v4399_v58  ;;  %v4327_v25 = vsub.s32 2, %v5991_v11  ;;  %v4315_v38 = vld [vmem:[%s7459_s8] sm:$0xf]  ;;  %v4323_v58 = vsub.s32 1, %v5991_v11 }
 0x3e2   : > { %v4360_v52 = vld [vmem:[%s7460_s9 + $0x78] sm:$0xff]  ;;  %v4331_v59 = vsub.s32 3, %v5991_v11 }
 0x3e4   : > { %5696 = vmatpush1.bf16.msra.mxu0 %v5695_v48  ;;  %5712 = vmatpush1.bf16.msra.mxu1 %v5711_v1  ;;  %v4402_v48 = vld [vmem:[%s7460_s9 + $0x1c8] sm:$0xff]  ;;  %v5731_v1 = vpack.c.bf16 %v4352_v62, %v4351_v21  ;;  %v4324_v21 = vrot.slane %v4315_v38, %v4323_v58  ;;  %v4332_v62 = vrot.slane %v4315_v38, %v4331_v59 }
 0x3e5   : > { %5698 = vmatprep.subr.bf16.mxu0 %v5697_v6  ;;  %5714 = vmatprep.subr.bf16.mxu1 %v5713_v7  ;;  %v4354_v6 = vld [vmem:[%s7460_s9 + $0x48] sm:$0xff]  ;;  %v5733_v7 = vpack.c.bf16 %v4370_v30, %v4369_v0  ;;  %v5765_v5 = vpack.c.bf16 %v4402_v48, %v4401_v31 }
 0x3e8   : > { %5700 = vmatpush1.bf16.msra.mxu0 %v5699_v8  ;;  %5716 = vmatpush1.bf16.msra.mxu1 %v5715_v9  ;;  %v5735_v8 = vpack.c.bf16 %v4354_v6, %v4353_v3  ;;  %v5767_v9 = vpack.c.bf16 %v4386_v49, %v4385_v43 }
 0x3e9   : > { %5718 = vmatprep.subr.bf16.mxu0 %v5717_v50  ;;  %5750 = vmatprep.subr.bf16.mxu1 %v5749_v18  ;;  %v5737_v50 = vpack.c.bf16 %v4372_v19, %v4371_v17  ;;  %v5769_v18 = vpack.c.bf16 %v4404_v36, %v4403_v20 }
 0x3eb   : > { %4766 = vmatmul.mubr.msk.f32.vlgmr.msra.gmra.mrb[28].mxu0 %vm2647_vm3, %v4166_v42  ;;  %4767 = vmatmul.mubr.msk.f32.vlgmr.msra.gmra.mrb[8].mxu1 %vm2647_vm3, %v4166_v42 }
 0x3ec   : > { %5720 = vmatpush3.bf16.msra.mxu0 %v5719_v29  ;;  %5752 = vmatpush3.bf16.msra.mxu1 %v5751_v34  ;;  %v5771_v29 = vpack.c.bf16 %v4388_v15, %v4387_v14  ;;  %v5741_v34 = vpack.c.bf16 %v4374_v22, %v4373_v16 }
 0x3ed   : > { %5722 = vmatprep.subr.bf16.mxu0 %v5721_v39  ;;  %5754 = vmatprep.subr.bf16.mxu1 %v5753_v33  ;;  %v5743_v39 = vpack.c.bf16 %v4358_v23, %v4357_v4  ;;  %v4390_v33 = vld [vmem:[%s7460_s9 + $0x168] sm:$0xff] }
 0x3ee   : > { %v5775_v42 = vpack.c.bf16 %v4390_v33, %v4389_v37 }
 0x3f0   : > { %5724 = vmatpush3.bf16.msra.mxu0 %v5723_v54  ;;  %5756 = vmatpush3.bf16.msra.mxu1 %v5755_v51  ;;  %v4359_v54 = vld [vmem:[%s7460_s9 + $0x70] sm:$0xff]  ;;  %v5777_v51 = vpack.c.bf16 %v4408_v47, %v4407_v46 }
 0x3f1   : > { %5726 = vmatprep.subr.bf16.mxu0 %v5725_v55  ;;  %5758 = vmatprep.subr.bf16.mxu1 %v5757_v32  ;;  %v4392_v55 = vld [vmem:[%s7460_s9 + $0x178] sm:$0xff]  ;;  %v5747_v32 = vpack.c.bf16 %v4360_v52, %v4359_v54 }
 0x3f2   : > { %v5779_v56 = vpack.c.bf16 %v4392_v55, %v4391_v53 }
 0x3f4   : > { %5728 = vmatpush3.bf16.msra.mxu0 %v5727_v60  ;;  %5760 = vmatpush3.bf16.msra.mxu1 %v5759_v61  ;;  %v4320_v60 = vrot.slane %v4315_v38, %v4319_v57  ;;  %v4328_v61 = vrot.slane %v4315_v38, %v4327_v25 }
 0x3f5   : > { %5730 = vmatprep.subr.bf16.mxu0 %v5729_v13  ;;  %5762 = vmatprep.subr.bf16.mxu1 %v5761_v24 }
 0x3f8   : > { %5732 = vmatpush3.bf16.msra.mxu0 %v5731_v1  ;;  %5764 = vmatpush3.bf16.msra.mxu1 %v5763_v2 }
 0x3f9   : > { %5734 = vmatprep.subr.bf16.mxu0 %v5733_v7  ;;  %5766 = vmatprep.subr.bf16.mxu1 %v5765_v5  ;;  %v4768_v5 = vld [vmem:[%s7461_s10] ss:$0 sm:$0xff] }
 0x3fc   : > { %5736 = vmatpush3.bf16.msra.mxu0 %v5735_v8  ;;  %5768 = vmatpush3.bf16.msra.mxu1 %v5767_v9 }
 0x3fd   : > { %5738 = vmatprep.subr.bf16.mxu0 %v5737_v50  ;;  %5770 = vmatprep.subr.bf16.mxu1 %v5769_v18 }
 0x400   : > { %5740 = vmatpush3.bf16.msra.mxu0 %v5739_v28  ;;  %5772 = vmatpush3.bf16.msra.mxu1 %v5771_v29 }
 0x401   : > { %5742 = vmatprep.subr.bf16.mxu0 %v5741_v34  ;;  %5774 = vmatprep.subr.bf16.mxu1 %v5773_v35 }
 0x404   : > { %5744 = vmatpush3.bf16.msra.mxu0 %v5743_v39  ;;  %5776 = vmatpush3.bf16.msra.mxu1 %v5775_v42 }
 0x405   : > { %5746 = vmatprep.subr.bf16.mxu0 %v5745_v45  ;;  %5778 = vmatprep.subr.bf16.mxu1 %v5777_v51 }
 0x408   : > { %5748 = vmatpush3.bf16.msra.mxu0 %v5747_v32  ;;  %5780 = vmatpush3.bf16.msra.mxu1 %v5779_v56 }
 0x4be   : > { %v4235_v13 = vpop.f32.mrb[28].mxu0  ;;  %v4306_v24 = vpop.f32.mrb[8].mxu1 }
 0x4bf   : > { %v4337_v27 = vadd.f32 %v4320_v60, %v4235_v13  ;;  %v4339_v63 = vadd.f32 %v4328_v61, %v4306_v24  ;;  %v4237_v0 = vpop.f32.mrb[29].mxu0  ;;  %v4308_v30 = vpop.f32.mrb[9].mxu1 }
 0x4c0   : > { %v4338_v31 = vadd.f32 %v4324_v21, %v4237_v0  ;;  %v4340_v48 = vadd.f32 %v4332_v62, %v4308_v30 }
 0x4c1   : > { %v4341_v3 = vmax.f32 %v4337_v27, 0.0  ;;  %v4343_v6 = vmax.f32 %v4339_v63, 0.0 }
 0x4c2   : > { %v4342_v1 = vmax.f32 %v4338_v31, 0.0  ;;  %v4344_v2 = vmax.f32 %v4340_v48, 0.0 }
 0x4c4   : > { %4480 = vmatprep.mubr.f32.mxu0 %v4342_v1  ;;  %4550 = vmatprep.mubr.f32.mxu1 %v4344_v2 }
 0x4c5   : > { %4481 = vmatmul.mubr.f32.vlgmr.msra.gmra.mrb[30].mxu0 %v4341_v3  ;;  %4551 = vmatmul.mubr.f32.vlgmr.msra.gmra.mrb[10].mxu1 %v4343_v6 }
 0x598   : > { %v4965_v11 = vpop.f32.mrb[30].mxu0  ;;  %v5000_v7 = vpop.f32.mrb[10].mxu1 }
 0x599   : > { %v4966_v43 = vpop.f32.mrb[31].mxu0  ;;  %v5001_v49 = vpop.f32.mrb[11].mxu1 }
 0x59a   : > { %v4967_v17 = vadd.f32 %v4966_v43, %v4965_v11  ;;  %v5002_v19 = vadd.f32 %v5001_v49, %v5000_v7 }
 0x59c   : > { %v4483_v20 = vadd.f32 %v4967_v17, %v4768_v5 }
 0x59e   : > { %v4553_v36 = vadd.f32 %v5002_v19, %v4483_v20 }
 0x5a0   : > { %4556 = vst [vmem:[%s384_s12] sm:$0x3] %v4553_v36 }
 0x5a1 PF: > { %s21_s17 = sadd.s32 1, %s5896_s17  }
 0x5a2   : > { %p18_p4 = scmp.ge.s32.totalorder %s21_s17, 4  }
 0x5a4   :  { %20 = sbr.rel (!%p18_p4) target bundleno = 1 (0x1), region = 108 }

</bundles_post_ra>
